<compile_context>
chip_gen: v6e
topology: v6e:2x2x1
jax: 0.10.0
libtpu: 0.0.40
codegen_flags: <defaults>
</compile_context>

<pallas_src>
import numpy as np
import jax
import jax.numpy as jnp
from jax.experimental import pallas as pl
from jax.experimental.pallas import tpu as pltpu


# ----------------------------------------------------------------------------
# DFT matrices (built once on host, exactly matching numpy/torch rfftn/irfftn
# semantics by evaluating the transforms on basis vectors).
# ----------------------------------------------------------------------------
def _rfft2_mats(h, w):
    """(h*w, h*wr) real/imag matrices M with rfft2(x).flat == x.flat @ (Mre+iMim)."""
    wr = w // 2 + 1
    basis = np.eye(h * w, dtype=np.float64).reshape(h * w, h, w)
    fc = np.fft.rfftn(basis, axes=(-2, -1), norm="ortho").reshape(h * w, h * wr)
    return np.ascontiguousarray(fc.real), np.ascontiguousarray(fc.imag)


def _irfft2_mats(h, w):
    """(h*wr, h*w) matrices G with irfft2(re+i*im).flat == re@Gre + im@Gim."""
    wr = w // 2 + 1
    basis = np.eye(h * wr, dtype=np.complex128).reshape(h * wr, h, wr)
    g_re = np.fft.irfftn(basis, s=(h, w), axes=(-2, -1), norm="ortho")
    g_im = np.fft.irfftn(1j * basis, s=(h, w), axes=(-2, -1), norm="ortho")
    return (g_re.reshape(h * wr, h * w), g_im.reshape(h * wr, h * w))


# ----------------------------------------------------------------------------
# Fused FFC kernel: one grid step = one batch sample, everything VMEM-resident.
# ----------------------------------------------------------------------------
_CONST_ORDER = (
    "w_l2l", "w_g2l", "w_l2g", "w_conv2", "w1", "b1",
    "f_re", "f_im", "w_rr", "w_ri", "w_ir", "w_ii", "b_fr", "b_fi",
    "g_re", "g_im", "k_re", "k_im", "b_lr", "b_li", "gt_re", "gt_im", "sel",
)


def _ffc_kernel(xl_ref, xg_ref,
                w_l2l, w_g2l, w_l2g, w_conv2, w1, b1,
                f_re, f_im, w_rr, w_ri, w_ir, w_ii, b_fr, b_fi,
                g_re, g_im, k_re, k_im, b_lr, b_li, gt_re, gt_im, sel,
                outl_ref, outg_ref):
    f32 = jnp.float32

    def dot(a, b):
        return jnp.dot(a, b, preferred_element_type=f32)

    xl = xl_ref[...]                                    # (in_cl, P)
    xg = xg_ref[...]                                    # (in_cg, P)

    # ---- out_xl = convl2l(x_l) + convg2l(x_g) --------------------------------
    outl_ref[...] = dot(w_l2l[...], xl) + dot(w_g2l[...], xg)

    # ---- SpectralTransform.conv1 + BN + ReLU (BN scale pre-folded into w1) ---
    st = jnp.maximum(dot(w1[...], xg) + b1[...], 0.0)   # (c_half, P)

    # ---- FourierUnit `fu`: rfft2 as DFT matmuls over the pixel axis ----------
    sre = dot(st, f_re[...])                            # (c_half, H*Wr)
    sim = dot(st, f_im[...])
    act_r = jnp.maximum(dot(w_rr[...], sre) + dot(w_ri[...], sim) + b_fr[...], 0.0)
    act_i = jnp.maximum(dot(w_ir[...], sre) + dot(w_ii[...], sim) + b_fi[...], 0.0)
    fu = dot(act_r, g_re[...]) + dot(act_i, g_im[...])  # (c_half, P)

    # ---- FourierUnit `lfu`: quadrant split + rfft2 + spectral conv + BN scale
    # are folded into k_re/k_im (per output channel); the 2x2 spatial repeat is
    # folded into gt_re/gt_im.  Rows are assembled with one-hot outer products
    # (no in-kernel concatenate / reshape needed).
    n_lfu = k_re.shape[0]
    n_spec = k_re.shape[2]
    sel_v = sel[...]                                    # (n_lfu, n_lfu) identity
    lre = jnp.zeros((n_lfu, n_spec), f32)
    lim = jnp.zeros((n_lfu, n_spec), f32)
    for o in range(n_lfu):
        col = sel_v[:, o:o + 1]                         # one-hot column (n_lfu, 1)
        # only channel 0 of st feeds the LFU (c_half // 4 == 1)
        lre = lre + col * dot(st, k_re[o])[0:1, :]
        lim = lim + col * dot(st, k_im[o])[0:1, :]
    lact_r = jnp.maximum(lre + b_lr[...], 0.0)
    lact_i = jnp.maximum(lim + b_li[...], 0.0)
    lfu = dot(lact_r, gt_re[...]) + dot(lact_i, gt_im[...])   # (c_half, P)

    # ---- out_xg = convl2g(x_l) + conv2(st + fu(st) + lfu(st)) -----------------
    outg_ref[...] = dot(w_l2g[...], xl) + dot(w_conv2[...], st + fu + lfu)


def _const_spec(a):
    nd = a.ndim
    return pl.BlockSpec(a.shape, lambda i, _nd=nd: (0,) * _nd)


def ffc_forward(x_l, x_g, consts):
    n, in_cl, h, w = x_l.shape
    in_cg = x_g.shape[1]
    p = h * w
    out_cl = consts["w_l2l"].shape[0]
    out_cg = consts["w_conv2"].shape[0]

    # free reshapes (no transpose): NCHW -> (N, C, H*W); lane axis = 256
    xl = x_l.reshape(n, in_cl, p).astype(jnp.float32)
    xg = x_g.reshape(n, in_cg, p).astype(jnp.float32)
    carr = [consts[k] for k in _CONST_ORDER]

    in_specs = ([pl.BlockSpec((None, in_cl, p), lambda i: (i, 0, 0)),
                 pl.BlockSpec((None, in_cg, p), lambda i: (i, 0, 0))]
                + [_const_spec(a) for a in carr])
    out_specs = (pl.BlockSpec((None, out_cl, p), lambda i: (i, 0, 0)),
                 pl.BlockSpec((None, out_cg, p), lambda i: (i, 0, 0)))
    out_shape = (jax.ShapeDtypeStruct((n, out_cl, p), jnp.float32),
                 jax.ShapeDtypeStruct((n, out_cg, p), jnp.float32))

    out_l, out_g = pl.pallas_call(
        _ffc_kernel,
        grid=(n,),
        in_specs=in_specs,
        out_specs=out_specs,
        out_shape=out_shape,
        compiler_params=pltpu.CompilerParams(
            dimension_semantics=("parallel",)),   # batch samples are independent
    )(xl, xg, *carr)

    return (out_l.reshape(n, out_cl, h, w), out_g.reshape(n, out_cg, h, w))


# ----------------------------------------------------------------------------
# Constant preparation: fold BN scales into weights, build DFT matrices, fold
# the LFU quadrant split / spectral conv / 2x2 repeat into constant matrices.
# ----------------------------------------------------------------------------
def prepare_ffc_constants(params, h, w):
    f64 = lambda a: np.asarray(a, dtype=np.float64)
    g = params["g2g"]
    c_half = int(g["conv1_w"].shape[0])
    assert h % 4 == 0 and w % 4 == 0
    assert c_half // 4 == 1, "LFU fold assumes a single LFU source channel"

    hw = h * w
    # full-resolution FourierUnit (`fu`)
    f_re, f_im = _rfft2_mats(h, w)            # (hw, h*wr)
    g_re, g_im = _irfft2_mats(h, w)           # (h*wr, hw)

    # half-resolution FourierUnit (`lfu`) on the 2x2 spatial quadrants
    h2, w2 = h // 2, w // 2
    fl_re, fl_im = _rfft2_mats(h2, w2)        # (h2*w2, h2*wr2)
    gl_re, gl_im = _irfft2_mats(h2, w2)
    n_spec_l = fl_re.shape[1]

    # quadrant gather folded into the forward DFT (order: TL, BL, TR, BR to
    # match torch's split(dim=-2)+cat then split(dim=-1)+cat)
    quads = ((0, 0), (h2, 0), (0, w2), (h2, w2))
    m_re = np.zeros((4, hw, n_spec_l))
    m_im = np.zeros((4, hw, n_spec_l))
    for q, (h0, w0) in enumerate(quads):
        for dh in range(h2):
            for dw in range(w2):
                p_full = (h0 + dh) * w + (w0 + dw)
                p_loc = dh * w2 + dw
                m_re[q, p_full, :] = fl_re[p_loc, :]
                m_im[q, p_full, :] = fl_im[p_loc, :]

    # fold the LFU spectral 1x1 conv (+ BN scale) into the quadrant DFTs
    wl, ls, lb = f64(g["lfu"]["w"]), f64(g["lfu"]["scale"]), f64(g["lfu"]["bias"])
    k_re = np.zeros((4, hw, n_spec_l))
    k_im = np.zeros((4, hw, n_spec_l))
    for o in range(4):
        for q in range(4):
            k_re[o] += wl[2 * o, 2 * q] * m_re[q] + wl[2 * o, 2 * q + 1] * m_im[q]
            k_im[o] += wl[2 * o + 1, 2 * q] * m_re[q] + wl[2 * o + 1, 2 * q + 1] * m_im[q]
        k_re[o] *= ls[2 * o]
        k_im[o] *= ls[2 * o + 1]

    # LFU inverse DFT with the 2x2 spatial repeat folded in
    tile_idx = np.array([(hh % h2) * w2 + (ww % w2)
                         for hh in range(h) for ww in range(w)])
    gt_re = gl_re[:, tile_idx]
    gt_im = gl_im[:, tile_idx]

    # FU spectral 1x1 conv split into re/im blocks (interleaved channel layout),
    # BN scale folded into the rows
    wf, fs, fb = f64(g["fu"]["w"]), f64(g["fu"]["scale"]), f64(g["fu"]["bias"])
    w_rr = fs[0::2, None] * wf[0::2, 0::2]
    w_ri = fs[0::2, None] * wf[0::2, 1::2]
    w_ir = fs[1::2, None] * wf[1::2, 0::2]
    w_ii = fs[1::2, None] * wf[1::2, 1::2]

    consts = {
        "w_l2l": f64(params["w_l2l"]),
        "w_g2l": f64(params["w_g2l"]),
        "w_l2g": f64(params["w_l2g"]),
        "w_conv2": f64(g["conv2_w"]),
        "w1": f64(g["bn1_scale"])[:, None] * f64(g["conv1_w"]),
        "b1": f64(g["bn1_bias"]).reshape(-1, 1),
        "f_re": f_re, "f_im": f_im,
        "w_rr": w_rr, "w_ri": w_ri, "w_ir": w_ir, "w_ii": w_ii,
        "b_fr": fb[0::2].reshape(-1, 1), "b_fi": fb[1::2].reshape(-1, 1),
        "g_re": g_re, "g_im": g_im,
        "k_re": k_re, "k_im": k_im,
        "b_lr": lb[0::2].reshape(-1, 1), "b_li": lb[1::2].reshape(-1, 1),
        "gt_re": gt_re, "gt_im": gt_im,
        "sel": np.eye(4),
    }
    return {k: jnp.asarray(v, jnp.float32) for k, v in consts.items()}


# ----------------------------------------------------------------------------
# Pure-JAX reference (mirrors the PyTorch module with jnp.fft) for validation.
# ----------------------------------------------------------------------------
def _conv1x1_nchw(w, x):
    return jnp.einsum("oi,nihw->nohw", w, x)


def _bn_affine(x, scale, bias):
    return x * scale[None, :, None, None] + bias[None, :, None, None]


def _fourier_unit_ref(x, w, scale, bias):
    n, c, h, wdt = x.shape
    ff = jnp.fft.rfftn(x, axes=(-2, -1), norm="ortho")
    ff = jnp.stack([jnp.real(ff), jnp.imag(ff)], axis=2)      # (n, c, 2, h, wr)
    ff = ff.reshape(n, 2 * c, h, ff.shape[-1])
    ff = jax.nn.relu(_bn_affine(_conv1x1_nchw(w, ff), scale, bias))
    ff = ff.reshape(n, -1, 2, h, ff.shape[-1])
    ffc = ff[:, :, 0] + 1j * ff[:, :, 1]
    return jnp.fft.irfftn(ffc, s=(h, wdt), axes=(-2, -1), norm="ortho")


def ffc_reference(x_l, x_g, params):
    g = params["g2g"]
    st = jax.nn.relu(_bn_affine(_conv1x1_nchw(g["conv1_w"], x_g),
                                g["bn1_scale"], g["bn1_bias"]))
    fu = _fourier_unit_ref(st, g["fu"]["w"], g["fu"]["scale"], g["fu"]["bias"])
    n, c, h, w = st.shape
    xs = st[:, : c // 4]
    xs = jnp.concatenate(jnp.split(xs, 2, axis=-2), axis=1)
    xs = jnp.concatenate(jnp.split(xs, 2, axis=-1), axis=1)
    xs = _fourier_unit_ref(xs, g["lfu"]["w"], g["lfu"]["scale"], g["lfu"]["bias"])
    xs = jnp.tile(xs, (1, 1, 2, 2))
    out_l = _conv1x1_nchw(params["w_l2l"], x_l) + _conv1x1_nchw(params["w_g2l"], x_g)
    out_g = (_conv1x1_nchw(params["w_l2g"], x_l)
             + _conv1x1_nchw(g["conv2_w"], st + fu + xs))
    return out_l, out_g


# ----------------------------------------------------------------------------
# Deterministic parameter init (shapes match the PyTorch __init__, eval-mode BN)
# ----------------------------------------------------------------------------
def _bn_fold(k, c, eps=1e-5):
    k1, k2 = jax.random.split(k)
    gamma = 1.0 + 0.1 * jax.random.normal(k1, (c,), jnp.float32)
    beta = 0.1 * jax.random.normal(k2, (c,), jnp.float32)
    mean = jnp.zeros((c,), jnp.float32)
    var = jnp.ones((c,), jnp.float32)
    scale = gamma / jnp.sqrt(var + eps)
    bias = beta - mean * scale
    return scale, bias


def init_params(key):
    in_cl, in_cg, out_cl, out_cg = 4, 4, 8, 8
    ks = list(jax.random.split(key, 12))

    def w(k, co, ci):   # Conv2d weight (Cout, Cin, 1, 1) squeezed to (Cout, Cin)
        return 0.1 * jax.random.normal(k, (co, ci), jnp.float32)

    fu_scale, fu_bias = _bn_fold(ks[6], out_cg)        # BN(2 * (out_cg // 2))
    lfu_scale, lfu_bias = _bn_fold(ks[7], out_cg)
    bn1_scale, bn1_bias = _bn_fold(ks[8], out_cg // 2)

    return {
        "w_l2l": w(ks[0], out_cl, in_cl),
        "w_l2g": w(ks[1], out_cg, in_cl),
        "w_g2l": w(ks[2], out_cl, in_cg),
        "g2g": {
            "conv1_w": w(ks[3], out_cg // 2, in_cg),
            "bn1_scale": bn1_scale,
            "bn1_bias": bn1_bias,
            "fu": {"w": w(ks[4], out_cg, out_cg), "scale": fu_scale, "bias": fu_bias},
            "lfu": {"w": w(ks[5], out_cg, out_cg), "scale": lfu_scale, "bias": lfu_bias},
            "conv2_w": w(ks[9], out_cg, out_cg // 2),
        },
    }


if __name__ == "__main__":
    key = jax.random.PRNGKey(0)
    k_xl, k_xg, k_p = jax.random.split(key, 3)

    # FFC input is the tuple (x_l, x_g): local and global channel groups.
    x_l = jax.random.normal(k_xl, (2, 4, 16, 16), jnp.float32)
    x_g = jax.random.normal(k_xg, (2, 4, 16, 16), jnp.float32)
    params = init_params(k_p)
    consts = prepare_ffc_constants(params, 16, 16)

    out_xl, out_xg = jax.jit(ffc_forward)(x_l, x_g, consts)
    jax.block_until_ready((out_xl, out_xg))

    assert out_xl.shape == (2, 8, 16, 16), out_xl.shape
    assert out_xg.shape == (2, 8, 16, 16), out_xg.shape
    assert bool(jnp.all(jnp.isfinite(out_xl))) and bool(jnp.all(jnp.isfinite(out_xg)))

    # validate against a pure-JAX (jnp.fft) reference of the same module
    ref_xl, ref_xg = jax.jit(ffc_reference)(x_l, x_g, params)
    err_l = float(jnp.max(jnp.abs(out_xl - ref_xl)))
    err_g = float(jnp.max(jnp.abs(out_xg - ref_xg)))
    assert err_l < 1e-2 and err_g < 1e-2, (err_l, err_g)

    print("KERNEL_OK")
</pallas_src>

<mosaic_0001>
module attributes {stable_mosaic.version = 11 : i64} {
  func.func @_ffc_kernel(%arg0: i32, %arg1: memref<1x4x256xf32, #tpu.memory_space<vmem>>, %arg2: memref<1x4x256xf32, #tpu.memory_space<vmem>>, %arg3: memref<8x4xf32, #tpu.memory_space<vmem>>, %arg4: memref<8x4xf32, #tpu.memory_space<vmem>>, %arg5: memref<8x4xf32, #tpu.memory_space<vmem>>, %arg6: memref<8x4xf32, #tpu.memory_space<vmem>>, %arg7: memref<4x4xf32, #tpu.memory_space<vmem>>, %arg8: memref<4x1xf32, #tpu.memory_space<vmem>>, %arg9: memref<256x144xf32, #tpu.memory_space<vmem>>, %arg10: memref<256x144xf32, #tpu.memory_space<vmem>>, %arg11: memref<4x4xf32, #tpu.memory_space<vmem>>, %arg12: memref<4x4xf32, #tpu.memory_space<vmem>>, %arg13: memref<4x4xf32, #tpu.memory_space<vmem>>, %arg14: memref<4x4xf32, #tpu.memory_space<vmem>>, %arg15: memref<4x1xf32, #tpu.memory_space<vmem>>, %arg16: memref<4x1xf32, #tpu.memory_space<vmem>>, %arg17: memref<144x256xf32, #tpu.memory_space<vmem>>, %arg18: memref<144x256xf32, #tpu.memory_space<vmem>>, %arg19: memref<4x256x40xf32, #tpu.memory_space<vmem>>, %arg20: memref<4x256x40xf32, #tpu.memory_space<vmem>>, %arg21: memref<4x1xf32, #tpu.memory_space<vmem>>, %arg22: memref<4x1xf32, #tpu.memory_space<vmem>>, %arg23: memref<40x256xf32, #tpu.memory_space<vmem>>, %arg24: memref<40x256xf32, #tpu.memory_space<vmem>>, %arg25: memref<4x4xf32, #tpu.memory_space<vmem>>, %arg26: memref<1x8x256xf32, #tpu.memory_space<vmem>>, %arg27: memref<1x8x256xf32, #tpu.memory_space<vmem>>) attributes {dimension_semantics = [#tpu.dimension_semantics<parallel>], iteration_bounds = array<i64: 2>, scalar_prefetch = 0 : i64, scratch_operands = 0 : i64, tpu.core_type = #tpu.core_type<tc>, window_params = [{transform_indices = @transform_0, window_bounds = array<i64: 1, 4, 256>}, {transform_indices = @transform_1, window_bounds = array<i64: 1, 4, 256>}, {pipeline_mode = #tpu.pipeline_mode<synchronous>, transform_indices = @transform_2, window_bounds = array<i64: 8, 4>}, {pipeline_mode = #tpu.pipeline_mode<synchronous>, transform_indices = @transform_3, window_bounds = array<i64: 8, 4>}, {pipeline_mode = #tpu.pipeline_mode<synchronous>, transform_indices = @transform_4, window_bounds = array<i64: 8, 4>}, {pipeline_mode = #tpu.pipeline_mode<synchronous>, transform_indices = @transform_5, window_bounds = array<i64: 8, 4>}, {pipeline_mode = #tpu.pipeline_mode<synchronous>, transform_indices = @transform_6, window_bounds = array<i64: 4, 4>}, {pipeline_mode = #tpu.pipeline_mode<synchronous>, transform_indices = @transform_7, window_bounds = array<i64: 4, 1>}, {pipeline_mode = #tpu.pipeline_mode<synchronous>, transform_indices = @transform_8, window_bounds = array<i64: 256, 144>}, {pipeline_mode = #tpu.pipeline_mode<synchronous>, transform_indices = @transform_9, window_bounds = array<i64: 256, 144>}, {pipeline_mode = #tpu.pipeline_mode<synchronous>, transform_indices = @transform_10, window_bounds = array<i64: 4, 4>}, {pipeline_mode = #tpu.pipeline_mode<synchronous>, transform_indices = @transform_11, window_bounds = array<i64: 4, 4>}, {pipeline_mode = #tpu.pipeline_mode<synchronous>, transform_indices = @transform_12, window_bounds = array<i64: 4, 4>}, {pipeline_mode = #tpu.pipeline_mode<synchronous>, transform_indices = @transform_13, window_bounds = array<i64: 4, 4>}, {pipeline_mode = #tpu.pipeline_mode<synchronous>, transform_indices = @transform_14, window_bounds = array<i64: 4, 1>}, {pipeline_mode = #tpu.pipeline_mode<synchronous>, transform_indices = @transform_15, window_bounds = array<i64: 4, 1>}, {pipeline_mode = #tpu.pipeline_mode<synchronous>, transform_indices = @transform_16, window_bounds = array<i64: 144, 256>}, {pipeline_mode = #tpu.pipeline_mode<synchronous>, transform_indices = @transform_17, window_bounds = array<i64: 144, 256>}, {pipeline_mode = #tpu.pipeline_mode<synchronous>, transform_indices = @transform_18, window_bounds = array<i64: 4, 256, 40>}, {pipeline_mode = #tpu.pipeline_mode<synchronous>, transform_indices = @transform_19, window_bounds = array<i64: 4, 256, 40>}, {pipeline_mode = #tpu.pipeline_mode<synchronous>, transform_indices = @transform_20, window_bounds = array<i64: 4, 1>}, {pipeline_mode = #tpu.pipeline_mode<synchronous>, transform_indices = @transform_21, window_bounds = array<i64: 4, 1>}, {pipeline_mode = #tpu.pipeline_mode<synchronous>, transform_indices = @transform_22, window_bounds = array<i64: 40, 256>}, {pipeline_mode = #tpu.pipeline_mode<synchronous>, transform_indices = @transform_23, window_bounds = array<i64: 40, 256>}, {pipeline_mode = #tpu.pipeline_mode<synchronous>, transform_indices = @transform_24, window_bounds = array<i64: 4, 4>}, {transform_indices = @transform_25, window_bounds = array<i64: 1, 8, 256>}, {transform_indices = @transform_26, window_bounds = array<i64: 1, 8, 256>}]} {
    %c0 = arith.constant 0 : index
    %c0_0 = arith.constant 0 : index
    %c0_1 = arith.constant 0 : index
    %0 = vector.load %arg1[%c0, %c0_0, %c0_1] : memref<1x4x256xf32, #tpu.memory_space<vmem>>, vector<1x4x256xf32>
    %1 = vector.shape_cast %0 : vector<1x4x256xf32> to vector<4x256xf32>
    %c0_2 = arith.constant 0 : index
    %c0_3 = arith.constant 0 : index
    %c0_4 = arith.constant 0 : index
    %2 = vector.load %arg2[%c0_2, %c0_3, %c0_4] : memref<1x4x256xf32, #tpu.memory_space<vmem>>, vector<1x4x256xf32>
    %3 = vector.shape_cast %2 : vector<1x4x256xf32> to vector<4x256xf32>
    %c0_5 = arith.constant 0 : index
    %c0_6 = arith.constant 0 : index
    %4 = vector.load %arg3[%c0_5, %c0_6] : memref<8x4xf32, #tpu.memory_space<vmem>>, vector<8x4xf32>
    %cst = arith.constant dense<0.000000e+00> : vector<8x256xf32>
    %5 = tpu.matmul %4, %1, %cst {dimension_numbers = #tpu.dot_dimension_numbers<[1], [0], [0], [1], [0, 0, 1, 1], [], []>} : vector<8x4xf32>, vector<4x256xf32>, vector<8x256xf32> -> vector<8x256xf32>
    %c0_7 = arith.constant 0 : index
    %c0_8 = arith.constant 0 : index
    %6 = vector.load %arg4[%c0_7, %c0_8] : memref<8x4xf32, #tpu.memory_space<vmem>>, vector<8x4xf32>
    %cst_9 = arith.constant dense<0.000000e+00> : vector<8x256xf32>
    %7 = tpu.matmul %6, %3, %cst_9 {dimension_numbers = #tpu.dot_dimension_numbers<[1], [0], [0], [1], [0, 0, 1, 1], [], []>} : vector<8x4xf32>, vector<4x256xf32>, vector<8x256xf32> -> vector<8x256xf32>
    %8 = arith.addf %5, %7 : vector<8x256xf32>
    %c0_10 = arith.constant 0 : index
    %c0_11 = arith.constant 0 : index
    %c0_12 = arith.constant 0 : index
    %9 = vector.load %arg26[%c0_10, %c0_11, %c0_12] : memref<1x8x256xf32, #tpu.memory_space<vmem>>, vector<1x8x256xf32>
    %10 = vector.shape_cast %9 : vector<1x8x256xf32> to vector<8x256xf32>
    %11 = vector.shape_cast %8 : vector<8x256xf32> to vector<1x8x256xf32>
    tpu.vector_store %arg26[%c0_10, %c0_11, %c0_12], %11 {strides = array<i32>} : memref<1x8x256xf32, #tpu.memory_space<vmem>>, vector<1x8x256xf32>,
    %c0_13 = arith.constant 0 : index
    %c0_14 = arith.constant 0 : index
    %12 = vector.load %arg7[%c0_13, %c0_14] : memref<4x4xf32, #tpu.memory_space<vmem>>, vector<4x4xf32>
    %cst_15 = arith.constant dense<0.000000e+00> : vector<4x256xf32>
    %13 = tpu.matmul %12, %3, %cst_15 {dimension_numbers = #tpu.dot_dimension_numbers<[1], [0], [0], [1], [0, 0, 1, 1], [], []>} : vector<4x4xf32>, vector<4x256xf32>, vector<4x256xf32> -> vector<4x256xf32>
    %c0_16 = arith.constant 0 : index
    %c0_17 = arith.constant 0 : index
    %14 = vector.load %arg8[%c0_16, %c0_17] : memref<4x1xf32, #tpu.memory_space<vmem>>, vector<4x1xf32>
    %15 = vector.broadcast %14 : vector<4x1xf32> to vector<4x256xf32>
    %16 = arith.addf %13, %15 : vector<4x256xf32>
    %cst_18 = arith.constant 0.000000e+00 : f32
    %17 = vector.broadcast %cst_18 : f32 to vector<4x256xf32>
    %18 = arith.maximumf %16, %17 : vector<4x256xf32>
    %c0_19 = arith.constant 0 : index
    %c0_20 = arith.constant 0 : index
    %19 = vector.load %arg9[%c0_19, %c0_20] : memref<256x144xf32, #tpu.memory_space<vmem>>, vector<256x144xf32>
    %cst_21 = arith.constant dense<0.000000e+00> : vector<4x144xf32>
    %20 = tpu.matmul %18, %19, %cst_21 {dimension_numbers = #tpu.dot_dimension_numbers<[1], [0], [0], [1], [0, 0, 1, 1], [], []>} : vector<4x256xf32>, vector<256x144xf32>, vector<4x144xf32> -> vector<4x144xf32>
    %c0_22 = arith.constant 0 : index
    %c0_23 = arith.constant 0 : index
    %21 = vector.load %arg10[%c0_22, %c0_23] : memref<256x144xf32, #tpu.memory_space<vmem>>, vector<256x144xf32>
    %cst_24 = arith.constant dense<0.000000e+00> : vector<4x144xf32>
    %22 = tpu.matmul %18, %21, %cst_24 {dimension_numbers = #tpu.dot_dimension_numbers<[1], [0], [0], [1], [0, 0, 1, 1], [], []>} : vector<4x256xf32>, vector<256x144xf32>, vector<4x144xf32> -> vector<4x144xf32>
    %c0_25 = arith.constant 0 : index
    %c0_26 = arith.constant 0 : index
    %23 = vector.load %arg11[%c0_25, %c0_26] : memref<4x4xf32, #tpu.memory_space<vmem>>, vector<4x4xf32>
    %cst_27 = arith.constant dense<0.000000e+00> : vector<4x144xf32>
    %24 = tpu.matmul %23, %20, %cst_27 {dimension_numbers = #tpu.dot_dimension_numbers<[1], [0], [0], [1], [0, 0, 1, 1], [], []>} : vector<4x4xf32>, vector<4x144xf32>, vector<4x144xf32> -> vector<4x144xf32>
    %c0_28 = arith.constant 0 : index
    %c0_29 = arith.constant 0 : index
    %25 = vector.load %arg12[%c0_28, %c0_29] : memref<4x4xf32, #tpu.memory_space<vmem>>, vector<4x4xf32>
    %cst_30 = arith.constant dense<0.000000e+00> : vector<4x144xf32>
    %26 = tpu.matmul %25, %22, %cst_30 {dimension_numbers = #tpu.dot_dimension_numbers<[1], [0], [0], [1], [0, 0, 1, 1], [], []>} : vector<4x4xf32>, vector<4x144xf32>, vector<4x144xf32> -> vector<4x144xf32>
    %27 = arith.addf %24, %26 : vector<4x144xf32>
    %c0_31 = arith.constant 0 : index
    %c0_32 = arith.constant 0 : index
    %28 = vector.load %arg15[%c0_31, %c0_32] : memref<4x1xf32, #tpu.memory_space<vmem>>, vector<4x1xf32>
    %29 = vector.broadcast %28 : vector<4x1xf32> to vector<4x144xf32>
    %30 = arith.addf %27, %29 : vector<4x144xf32>
    %cst_33 = arith.constant 0.000000e+00 : f32
    %31 = vector.broadcast %cst_33 : f32 to vector<4x144xf32>
    %32 = arith.maximumf %30, %31 : vector<4x144xf32>
    %c0_34 = arith.constant 0 : index
    %c0_35 = arith.constant 0 : index
    %33 = vector.load %arg13[%c0_34, %c0_35] : memref<4x4xf32, #tpu.memory_space<vmem>>, vector<4x4xf32>
    %cst_36 = arith.constant dense<0.000000e+00> : vector<4x144xf32>
    %34 = tpu.matmul %33, %20, %cst_36 {dimension_numbers = #tpu.dot_dimension_numbers<[1], [0], [0], [1], [0, 0, 1, 1], [], []>} : vector<4x4xf32>, vector<4x144xf32>, vector<4x144xf32> -> vector<4x144xf32>
    %c0_37 = arith.constant 0 : index
    %c0_38 = arith.constant 0 : index
    %35 = vector.load %arg14[%c0_37, %c0_38] : memref<4x4xf32, #tpu.memory_space<vmem>>, vector<4x4xf32>
    %cst_39 = arith.constant dense<0.000000e+00> : vector<4x144xf32>
    %36 = tpu.matmul %35, %22, %cst_39 {dimension_numbers = #tpu.dot_dimension_numbers<[1], [0], [0], [1], [0, 0, 1, 1], [], []>} : vector<4x4xf32>, vector<4x144xf32>, vector<4x144xf32> -> vector<4x144xf32>
    %37 = arith.addf %34, %36 : vector<4x144xf32>
    %c0_40 = arith.constant 0 : index
    %c0_41 = arith.constant 0 : index
    %38 = vector.load %arg16[%c0_40, %c0_41] : memref<4x1xf32, #tpu.memory_space<vmem>>, vector<4x1xf32>
    %39 = vector.broadcast %38 : vector<4x1xf32> to vector<4x144xf32>
    %40 = arith.addf %37, %39 : vector<4x144xf32>
    %cst_42 = arith.constant 0.000000e+00 : f32
    %41 = vector.broadcast %cst_42 : f32 to vector<4x144xf32>
    %42 = arith.maximumf %40, %41 : vector<4x144xf32>
    %c0_43 = arith.constant 0 : index
    %c0_44 = arith.constant 0 : index
    %43 = vector.load %arg17[%c0_43, %c0_44] : memref<144x256xf32, #tpu.memory_space<vmem>>, vector<144x256xf32>
    %cst_45 = arith.constant dense<0.000000e+00> : vector<4x256xf32>
    %44 = tpu.matmul %32, %43, %cst_45 {dimension_numbers = #tpu.dot_dimension_numbers<[1], [0], [0], [1], [0, 0, 1, 1], [], []>} : vector<4x144xf32>, vector<144x256xf32>, vector<4x256xf32> -> vector<4x256xf32>
    %c0_46 = arith.constant 0 : index
    %c0_47 = arith.constant 0 : index
    %45 = vector.load %arg18[%c0_46, %c0_47] : memref<144x256xf32, #tpu.memory_space<vmem>>, vector<144x256xf32>
    %cst_48 = arith.constant dense<0.000000e+00> : vector<4x256xf32>
    %46 = tpu.matmul %42, %45, %cst_48 {dimension_numbers = #tpu.dot_dimension_numbers<[1], [0], [0], [1], [0, 0, 1, 1], [], []>} : vector<4x144xf32>, vector<144x256xf32>, vector<4x256xf32> -> vector<4x256xf32>
    %47 = arith.addf %44, %46 : vector<4x256xf32>
    %c0_49 = arith.constant 0 : index
    %c0_50 = arith.constant 0 : index
    %48 = vector.load %arg25[%c0_49, %c0_50] : memref<4x4xf32, #tpu.memory_space<vmem>>, vector<4x4xf32>
    %cst_51 = arith.constant 0.000000e+00 : f32
    %49 = vector.broadcast %cst_51 : f32 to vector<4x40xf32>
    %cst_52 = arith.constant 0.000000e+00 : f32
    %50 = vector.broadcast %cst_52 : f32 to vector<4x40xf32>
    %51 = vector.extract_strided_slice %48 {offsets = [0, 0], sizes = [4, 1], strides = [1, 1]} : vector<4x4xf32> to vector<4x1xf32>
    %c0_53 = arith.constant 0 : index
    %c0_54 = arith.constant 0 : index
    %c0_55 = arith.constant 0 : index
    %52 = vector.load %arg19[%c0_53, %c0_54, %c0_55] : memref<4x256x40xf32, #tpu.memory_space<vmem>>, vector<1x256x40xf32>
    %53 = vector.shape_cast %52 : vector<1x256x40xf32> to vector<256x40xf32>
    %cst_56 = arith.constant dense<0.000000e+00> : vector<4x40xf32>
    %54 = tpu.matmul %18, %53, %cst_56 {dimension_numbers = #tpu.dot_dimension_numbers<[1], [0], [0], [1], [0, 0, 1, 1], [], []>} : vector<4x256xf32>, vector<256x40xf32>, vector<4x40xf32> -> vector<4x40xf32>
    %55 = vector.extract_strided_slice %54 {offsets = [0, 0], sizes = [1, 40], strides = [1, 1]} : vector<4x40xf32> to vector<1x40xf32>
    %56 = vector.broadcast %51 : vector<4x1xf32> to vector<4x40xf32>
    %57 = vector.broadcast %55 : vector<1x40xf32> to vector<4x40xf32>
    %58 = arith.mulf %56, %57 : vector<4x40xf32>
    %59 = arith.addf %49, %58 : vector<4x40xf32>
    %c0_57 = arith.constant 0 : index
    %c0_58 = arith.constant 0 : index
    %c0_59 = arith.constant 0 : index
    %60 = vector.load %arg20[%c0_57, %c0_58, %c0_59] : memref<4x256x40xf32, #tpu.memory_space<vmem>>, vector<1x256x40xf32>
    %61 = vector.shape_cast %60 : vector<1x256x40xf32> to vector<256x40xf32>
    %cst_60 = arith.constant dense<0.000000e+00> : vector<4x40xf32>
    %62 = tpu.matmul %18, %61, %cst_60 {dimension_numbers = #tpu.dot_dimension_numbers<[1], [0], [0], [1], [0, 0, 1, 1], [], []>} : vector<4x256xf32>, vector<256x40xf32>, vector<4x40xf32> -> vector<4x40xf32>
    %63 = vector.extract_strided_slice %62 {offsets = [0, 0], sizes = [1, 40], strides = [1, 1]} : vector<4x40xf32> to vector<1x40xf32>
    %64 = vector.broadcast %51 : vector<4x1xf32> to vector<4x40xf32>
    %65 = vector.broadcast %63 : vector<1x40xf32> to vector<4x40xf32>
    %66 = arith.mulf %64, %65 : vector<4x40xf32>
    %67 = arith.addf %50, %66 : vector<4x40xf32>
    %68 = vector.extract_strided_slice %48 {offsets = [0, 1], sizes = [4, 1], strides = [1, 1]} : vector<4x4xf32> to vector<4x1xf32>
    %c1 = arith.constant 1 : index
    %c0_61 = arith.constant 0 : index
    %c0_62 = arith.constant 0 : index
    %69 = vector.load %arg19[%c1, %c0_61, %c0_62] : memref<4x256x40xf32, #tpu.memory_space<vmem>>, vector<1x256x40xf32>
    %70 = vector.shape_cast %69 : vector<1x256x40xf32> to vector<256x40xf32>
    %cst_63 = arith.constant dense<0.000000e+00> : vector<4x40xf32>
    %71 = tpu.matmul %18, %70, %cst_63 {dimension_numbers = #tpu.dot_dimension_numbers<[1], [0], [0], [1], [0, 0, 1, 1], [], []>} : vector<4x256xf32>, vector<256x40xf32>, vector<4x40xf32> -> vector<4x40xf32>
    %72 = vector.extract_strided_slice %71 {offsets = [0, 0], sizes = [1, 40], strides = [1, 1]} : vector<4x40xf32> to vector<1x40xf32>
    %73 = vector.broadcast %68 : vector<4x1xf32> to vector<4x40xf32>
    %74 = vector.broadcast %72 : vector<1x40xf32> to vector<4x40xf32>
    %75 = arith.mulf %73, %74 : vector<4x40xf32>
    %76 = arith.addf %59, %75 : vector<4x40xf32>
    %c1_64 = arith.constant 1 : index
    %c0_65 = arith.constant 0 : index
    %c0_66 = arith.constant 0 : index
    %77 = vector.load %arg20[%c1_64, %c0_65, %c0_66] : memref<4x256x40xf32, #tpu.memory_space<vmem>>, vector<1x256x40xf32>
    %78 = vector.shape_cast %77 : vector<1x256x40xf32> to vector<256x40xf32>
    %cst_67 = arith.constant dense<0.000000e+00> : vector<4x40xf32>
    %79 = tpu.matmul %18, %78, %cst_67 {dimension_numbers = #tpu.dot_dimension_numbers<[1], [0], [0], [1], [0, 0, 1, 1], [], []>} : vector<4x256xf32>, vector<256x40xf32>, vector<4x40xf32> -> vector<4x40xf32>
    %80 = vector.extract_strided_slice %79 {offsets = [0, 0], sizes = [1, 40], strides = [1, 1]} : vector<4x40xf32> to vector<1x40xf32>
    %81 = vector.broadcast %68 : vector<4x1xf32> to vector<4x40xf32>
    %82 = vector.broadcast %80 : vector<1x40xf32> to vector<4x40xf32>
    %83 = arith.mulf %81, %82 : vector<4x40xf32>
    %84 = arith.addf %67, %83 : vector<4x40xf32>
    %85 = vector.extract_strided_slice %48 {offsets = [0, 2], sizes = [4, 1], strides = [1, 1]} : vector<4x4xf32> to vector<4x1xf32>
    %c2 = arith.constant 2 : index
    %c0_68 = arith.constant 0 : index
    %c0_69 = arith.constant 0 : index
    %86 = vector.load %arg19[%c2, %c0_68, %c0_69] : memref<4x256x40xf32, #tpu.memory_space<vmem>>, vector<1x256x40xf32>
    %87 = vector.shape_cast %86 : vector<1x256x40xf32> to vector<256x40xf32>
    %cst_70 = arith.constant dense<0.000000e+00> : vector<4x40xf32>
    %88 = tpu.matmul %18, %87, %cst_70 {dimension_numbers = #tpu.dot_dimension_numbers<[1], [0], [0], [1], [0, 0, 1, 1], [], []>} : vector<4x256xf32>, vector<256x40xf32>, vector<4x40xf32> -> vector<4x40xf32>
    %89 = vector.extract_strided_slice %88 {offsets = [0, 0], sizes = [1, 40], strides = [1, 1]} : vector<4x40xf32> to vector<1x40xf32>
    %90 = vector.broadcast %85 : vector<4x1xf32> to vector<4x40xf32>
    %91 = vector.broadcast %89 : vector<1x40xf32> to vector<4x40xf32>
    %92 = arith.mulf %90, %91 : vector<4x40xf32>
    %93 = arith.addf %76, %92 : vector<4x40xf32>
    %c2_71 = arith.constant 2 : index
    %c0_72 = arith.constant 0 : index
    %c0_73 = arith.constant 0 : index
    %94 = vector.load %arg20[%c2_71, %c0_72, %c0_73] : memref<4x256x40xf32, #tpu.memory_space<vmem>>, vector<1x256x40xf32>
    %95 = vector.shape_cast %94 : vector<1x256x40xf32> to vector<256x40xf32>
    %cst_74 = arith.constant dense<0.000000e+00> : vector<4x40xf32>
    %96 = tpu.matmul %18, %95, %cst_74 {dimension_numbers = #tpu.dot_dimension_numbers<[1], [0], [0], [1], [0, 0, 1, 1], [], []>} : vector<4x256xf32>, vector<256x40xf32>, vector<4x40xf32> -> vector<4x40xf32>
    %97 = vector.extract_strided_slice %96 {offsets = [0, 0], sizes = [1, 40], strides = [1, 1]} : vector<4x40xf32> to vector<1x40xf32>
    %98 = vector.broadcast %85 : vector<4x1xf32> to vector<4x40xf32>
    %99 = vector.broadcast %97 : vector<1x40xf32> to vector<4x40xf32>
    %100 = arith.mulf %98, %99 : vector<4x40xf32>
    %101 = arith.addf %84, %100 : vector<4x40xf32>
    %102 = vector.extract_strided_slice %48 {offsets = [0, 3], sizes = [4, 1], strides = [1, 1]} : vector<4x4xf32> to vector<4x1xf32>
    %c3 = arith.constant 3 : index
    %c0_75 = arith.constant 0 : index
    %c0_76 = arith.constant 0 : index
    %103 = vector.load %arg19[%c3, %c0_75, %c0_76] : memref<4x256x40xf32, #tpu.memory_space<vmem>>, vector<1x256x40xf32>
    %104 = vector.shape_cast %103 : vector<1x256x40xf32> to vector<256x40xf32>
    %cst_77 = arith.constant dense<0.000000e+00> : vector<4x40xf32>
    %105 = tpu.matmul %18, %104, %cst_77 {dimension_numbers = #tpu.dot_dimension_numbers<[1], [0], [0], [1], [0, 0, 1, 1], [], []>} : vector<4x256xf32>, vector<256x40xf32>, vector<4x40xf32> -> vector<4x40xf32>
    %106 = vector.extract_strided_slice %105 {offsets = [0, 0], sizes = [1, 40], strides = [1, 1]} : vector<4x40xf32> to vector<1x40xf32>
    %107 = vector.broadcast %102 : vector<4x1xf32> to vector<4x40xf32>
    %108 = vector.broadcast %106 : vector<1x40xf32> to vector<4x40xf32>
    %109 = arith.mulf %107, %108 : vector<4x40xf32>
    %110 = arith.addf %93, %109 : vector<4x40xf32>
    %c3_78 = arith.constant 3 : index
    %c0_79 = arith.constant 0 : index
    %c0_80 = arith.constant 0 : index
    %111 = vector.load %arg20[%c3_78, %c0_79, %c0_80] : memref<4x256x40xf32, #tpu.memory_space<vmem>>, vector<1x256x40xf32>
    %112 = vector.shape_cast %111 : vector<1x256x40xf32> to vector<256x40xf32>
    %cst_81 = arith.constant dense<0.000000e+00> : vector<4x40xf32>
    %113 = tpu.matmul %18, %112, %cst_81 {dimension_numbers = #tpu.dot_dimension_numbers<[1], [0], [0], [1], [0, 0, 1, 1], [], []>} : vector<4x256xf32>, vector<256x40xf32>, vector<4x40xf32> -> vector<4x40xf32>
    %114 = vector.extract_strided_slice %113 {offsets = [0, 0], sizes = [1, 40], strides = [1, 1]} : vector<4x40xf32> to vector<1x40xf32>
    %115 = vector.broadcast %102 : vector<4x1xf32> to vector<4x40xf32>
    %116 = vector.broadcast %114 : vector<1x40xf32> to vector<4x40xf32>
    %117 = arith.mulf %115, %116 : vector<4x40xf32>
    %118 = arith.addf %101, %117 : vector<4x40xf32>
    %c0_82 = arith.constant 0 : index
    %c0_83 = arith.constant 0 : index
    %119 = vector.load %arg21[%c0_82, %c0_83] : memref<4x1xf32, #tpu.memory_space<vmem>>, vector<4x1xf32>
    %120 = vector.broadcast %119 : vector<4x1xf32> to vector<4x40xf32>
    %121 = arith.addf %110, %120 : vector<4x40xf32>
    %cst_84 = arith.constant 0.000000e+00 : f32
    %122 = vector.broadcast %cst_84 : f32 to vector<4x40xf32>
    %123 = arith.maximumf %121, %122 : vector<4x40xf32>
    %c0_85 = arith.constant 0 : index
    %c0_86 = arith.constant 0 : index
    %124 = vector.load %arg22[%c0_85, %c0_86] : memref<4x1xf32, #tpu.memory_space<vmem>>, vector<4x1xf32>
    %125 = vector.broadcast %124 : vector<4x1xf32> to vector<4x40xf32>
    %126 = arith.addf %118, %125 : vector<4x40xf32>
    %cst_87 = arith.constant 0.000000e+00 : f32
    %127 = vector.broadcast %cst_87 : f32 to vector<4x40xf32>
    %128 = arith.maximumf %126, %127 : vector<4x40xf32>
    %c0_88 = arith.constant 0 : index
    %c0_89 = arith.constant 0 : index
    %129 = vector.load %arg23[%c0_88, %c0_89] : memref<40x256xf32, #tpu.memory_space<vmem>>, vector<40x256xf32>
    %cst_90 = arith.constant dense<0.000000e+00> : vector<4x256xf32>
    %130 = tpu.matmul %123, %129, %cst_90 {dimension_numbers = #tpu.dot_dimension_numbers<[1], [0], [0], [1], [0, 0, 1, 1], [], []>} : vector<4x40xf32>, vector<40x256xf32>, vector<4x256xf32> -> vector<4x256xf32>
    %c0_91 = arith.constant 0 : index
    %c0_92 = arith.constant 0 : index
    %131 = vector.load %arg24[%c0_91, %c0_92] : memref<40x256xf32, #tpu.memory_space<vmem>>, vector<40x256xf32>
    %cst_93 = arith.constant dense<0.000000e+00> : vector<4x256xf32>
    %132 = tpu.matmul %128, %131, %cst_93 {dimension_numbers = #tpu.dot_dimension_numbers<[1], [0], [0], [1], [0, 0, 1, 1], [], []>} : vector<4x40xf32>, vector<40x256xf32>, vector<4x256xf32> -> vector<4x256xf32>
    %133 = arith.addf %130, %132 : vector<4x256xf32>
    %c0_94 = arith.constant 0 : index
    %c0_95 = arith.constant 0 : index
    %134 = vector.load %arg5[%c0_94, %c0_95] : memref<8x4xf32, #tpu.memory_space<vmem>>, vector<8x4xf32>
    %cst_96 = arith.constant dense<0.000000e+00> : vector<8x256xf32>
    %135 = tpu.matmul %134, %1, %cst_96 {dimension_numbers = #tpu.dot_dimension_numbers<[1], [0], [0], [1], [0, 0, 1, 1], [], []>} : vector<8x4xf32>, vector<4x256xf32>, vector<8x256xf32> -> vector<8x256xf32>
    %c0_97 = arith.constant 0 : index
    %c0_98 = arith.constant 0 : index
    %136 = vector.load %arg6[%c0_97, %c0_98] : memref<8x4xf32, #tpu.memory_space<vmem>>, vector<8x4xf32>
    %137 = arith.addf %18, %47 : vector<4x256xf32>
    %138 = arith.addf %137, %133 : vector<4x256xf32>
    %cst_99 = arith.constant dense<0.000000e+00> : vector<8x256xf32>
    %139 = tpu.matmul %136, %138, %cst_99 {dimension_numbers = #tpu.dot_dimension_numbers<[1], [0], [0], [1], [0, 0, 1, 1], [], []>} : vector<8x4xf32>, vector<4x256xf32>, vector<8x256xf32> -> vector<8x256xf32>
    %140 = arith.addf %135, %139 : vector<8x256xf32>
    %c0_100 = arith.constant 0 : index
    %c0_101 = arith.constant 0 : index
    %c0_102 = arith.constant 0 : index
    %141 = vector.load %arg27[%c0_100, %c0_101, %c0_102] : memref<1x8x256xf32, #tpu.memory_space<vmem>>, vector<1x8x256xf32>
    %142 = vector.shape_cast %141 : vector<1x8x256xf32> to vector<8x256xf32>
    %143 = vector.shape_cast %140 : vector<8x256xf32> to vector<1x8x256xf32>
    tpu.vector_store %arg27[%c0_100, %c0_101, %c0_102], %143 {strides = array<i32>} : memref<1x8x256xf32, #tpu.memory_space<vmem>>, vector<1x8x256xf32>,
    return
  }
  func.func @transform_0(%arg0: i32) -> (i32, i32, i32) {
    %c0_i32 = arith.constant 0 : i32
    %c0_i32_0 = arith.constant 0 : i32
    %c0_i32_1 = arith.constant 0 : i32
    return %arg0, %c0_i32, %c0_i32_0 : i32, i32, i32
  }
  func.func @transform_1(%arg0: i32) -> (i32, i32, i32) {
    %c0_i32 = arith.constant 0 : i32
    %c0_i32_0 = arith.constant 0 : i32
    %c0_i32_1 = arith.constant 0 : i32
    return %arg0, %c0_i32, %c0_i32_0 : i32, i32, i32
  }
  func.func @transform_2(%arg0: i32) -> (i32, i32) {
    %c0_i32 = arith.constant 0 : i32
    %c0_i32_0 = arith.constant 0 : i32
    %c0_i32_1 = arith.constant 0 : i32
    return %c0_i32, %c0_i32_0 : i32, i32
  }
  func.func @transform_3(%arg0: i32) -> (i32, i32) {
    %c0_i32 = arith.constant 0 : i32
    %c0_i32_0 = arith.constant 0 : i32
    %c0_i32_1 = arith.constant 0 : i32
    return %c0_i32, %c0_i32_0 : i32, i32
  }
  func.func @transform_4(%arg0: i32) -> (i32, i32) {
    %c0_i32 = arith.constant 0 : i32
    %c0_i32_0 = arith.constant 0 : i32
    %c0_i32_1 = arith.constant 0 : i32
    return %c0_i32, %c0_i32_0 : i32, i32
  }
  func.func @transform_5(%arg0: i32) -> (i32, i32) {
    %c0_i32 = arith.constant 0 : i32
    %c0_i32_0 = arith.constant 0 : i32
    %c0_i32_1 = arith.constant 0 : i32
    return %c0_i32, %c0_i32_0 : i32, i32
  }
  func.func @transform_6(%arg0: i32) -> (i32, i32) {
    %c0_i32 = arith.constant 0 : i32
    %c0_i32_0 = arith.constant 0 : i32
    %c0_i32_1 = arith.constant 0 : i32
    return %c0_i32, %c0_i32_0 : i32, i32
  }
  func.func @transform_7(%arg0: i32) -> (i32, i32) {
    %c0_i32 = arith.constant 0 : i32
    %c0_i32_0 = arith.constant 0 : i32
    %c0_i32_1 = arith.constant 0 : i32
    return %c0_i32, %c0_i32_0 : i32, i32
  }
  func.func @transform_8(%arg0: i32) -> (i32, i32) {
    %c0_i32 = arith.constant 0 : i32
    %c0_i32_0 = arith.constant 0 : i32
    %c0_i32_1 = arith.constant 0 : i32
    return %c0_i32, %c0_i32_0 : i32, i32
  }
  func.func @transform_9(%arg0: i32) -> (i32, i32) {
    %c0_i32 = arith.constant 0 : i32
    %c0_i32_0 = arith.constant 0 : i32
    %c0_i32_1 = arith.constant 0 : i32
    return %c0_i32, %c0_i32_0 : i32, i32
  }
  func.func @transform_10(%arg0: i32) -> (i32, i32) {
    %c0_i32 = arith.constant 0 : i32
    %c0_i32_0 = arith.constant 0 : i32
    %c0_i32_1 = arith.constant 0 : i32
    return %c0_i32, %c0_i32_0 : i32, i32
  }
  func.func @transform_11(%arg0: i32) -> (i32, i32) {
    %c0_i32 = arith.constant 0 : i32
    %c0_i32_0 = arith.constant 0 : i32
    %c0_i32_1 = arith.constant 0 : i32
    return %c0_i32, %c0_i32_0 : i32, i32
  }
  func.func @transform_12(%arg0: i32) -> (i32, i32) {
    %c0_i32 = arith.constant 0 : i32
    %c0_i32_0 = arith.constant 0 : i32
    %c0_i32_1 = arith.constant 0 : i32
    return %c0_i32, %c0_i32_0 : i32, i32
  }
  func.func @transform_13(%arg0: i32) -> (i32, i32) {
    %c0_i32 = arith.constant 0 : i32
    %c0_i32_0 = arith.constant 0 : i32
    %c0_i32_1 = arith.constant 0 : i32
    return %c0_i32, %c0_i32_0 : i32, i32
  }
  func.func @transform_14(%arg0: i32) -> (i32, i32) {
    %c0_i32 = arith.constant 0 : i32
    %c0_i32_0 = arith.constant 0 : i32
    %c0_i32_1 = arith.constant 0 : i32
    return %c0_i32, %c0_i32_0 : i32, i32
  }
  func.func @transform_15(%arg0: i32) -> (i32, i32) {
    %c0_i32 = arith.constant 0 : i32
    %c0_i32_0 = arith.constant 0 : i32
    %c0_i32_1 = arith.constant 0 : i32
    return %c0_i32, %c0_i32_0 : i32, i32
  }
  func.func @transform_16(%arg0: i32) -> (i32, i32) {
    %c0_i32 = arith.constant 0 : i32
    %c0_i32_0 = arith.constant 0 : i32
    %c0_i32_1 = arith.constant 0 : i32
    return %c0_i32, %c0_i32_0 : i32, i32
  }
  func.func @transform_17(%arg0: i32) -> (i32, i32) {
    %c0_i32 = arith.constant 0 : i32
    %c0_i32_0 = arith.constant 0 : i32
    %c0_i32_1 = arith.constant 0 : i32
    return %c0_i32, %c0_i32_0 : i32, i32
  }
  func.func @transform_18(%arg0: i32) -> (i32, i32, i32) {
    %c0_i32 = arith.constant 0 : i32
    %c0_i32_0 = arith.constant 0 : i32
    %c0_i32_1 = arith.constant 0 : i32
    %c0_i32_2 = arith.constant 0 : i32
    return %c0_i32, %c0_i32_0, %c0_i32_1 : i32, i32, i32
  }
  func.func @transform_19(%arg0: i32) -> (i32, i32, i32) {
    %c0_i32 = arith.constant 0 : i32
    %c0_i32_0 = arith.constant 0 : i32
    %c0_i32_1 = arith.constant 0 : i32
    %c0_i32_2 = arith.constant 0 : i32
    return %c0_i32, %c0_i32_0, %c0_i32_1 : i32, i32, i32
  }
  func.func @transform_20(%arg0: i32) -> (i32, i32) {
    %c0_i32 = arith.constant 0 : i32
    %c0_i32_0 = arith.constant 0 : i32
    %c0_i32_1 = arith.constant 0 : i32
    return %c0_i32, %c0_i32_0 : i32, i32
  }
  func.func @transform_21(%arg0: i32) -> (i32, i32) {
    %c0_i32 = arith.constant 0 : i32
    %c0_i32_0 = arith.constant 0 : i32
    %c0_i32_1 = arith.constant 0 : i32
    return %c0_i32, %c0_i32_0 : i32, i32
  }
  func.func @transform_22(%arg0: i32) -> (i32, i32) {
    %c0_i32 = arith.constant 0 : i32
    %c0_i32_0 = arith.constant 0 : i32
    %c0_i32_1 = arith.constant 0 : i32
    return %c0_i32, %c0_i32_0 : i32, i32
  }
  func.func @transform_23(%arg0: i32) -> (i32, i32) {
    %c0_i32 = arith.constant 0 : i32
    %c0_i32_0 = arith.constant 0 : i32
    %c0_i32_1 = arith.constant 0 : i32
    return %c0_i32, %c0_i32_0 : i32, i32
  }
  func.func @transform_24(%arg0: i32) -> (i32, i32) {
    %c0_i32 = arith.constant 0 : i32
    %c0_i32_0 = arith.constant 0 : i32
    %c0_i32_1 = arith.constant 0 : i32
    return %c0_i32, %c0_i32_0 : i32, i32
  }
  func.func @transform_25(%arg0: i32) -> (i32, i32, i32) {
    %c0_i32 = arith.constant 0 : i32
    %c0_i32_0 = arith.constant 0 : i32
    %c0_i32_1 = arith.constant 0 : i32
    return %arg0, %c0_i32, %c0_i32_0 : i32, i32, i32
  }
  func.func @transform_26(%arg0: i32) -> (i32, i32, i32) {
    %c0_i32 = arith.constant 0 : i32
    %c0_i32_0 = arith.constant 0 : i32
    %c0_i32_1 = arith.constant 0 : i32
    return %arg0, %c0_i32, %c0_i32_0 : i32, i32, i32
  }
}

</mosaic_0001>

<bundles_post_ra>
// kernel: ffc_forward.1
= control target key start
LH: loop header
LB: loop body
LE: loop exit
PB: predicated region body
PF: predicated region fallthrough
CT: control target
= control target key end

     0   :  { %s3928_s27 = smov 0   ;;  %s5519_s0 = inlined_call_operand.vmem [shape: f32[2,4,256], index: 0, kind: input, shape index: {}]   ;;  %s5520_s1 = inlined_call_operand.vmem [shape: f32[2,4,256], index: 1, kind: input, shape index: {}]   ;;  %s5521_s2 = inlined_call_operand.vmem [shape: f32[8,4], index: 2, kind: input, shape index: {}]   ;;  %s5522_s3 = inlined_call_operand.vmem [shape: f32[8,4], index: 3, kind: input, shape index: {}]   ;;  %s5523_s4 = inlined_call_operand.vmem [shape: f32[8,4], index: 4, kind: input, shape index: {}]   ;;  %s5524_s5 = inlined_call_operand.vmem [shape: f32[8,4], index: 5, kind: input, shape index: {}]   ;;  %s5525_s6 = inlined_call_operand.vmem [shape: f32[4,4], index: 6, kind: input, shape index: {}]   ;;  %s5526_s7 = inlined_call_operand.vmem [shape: f32[4,1], index: 7, kind: input, shape index: {}]   ;;  %s5527_s8 = inlined_call_operand.vmem [shape: f32[256,144], index: 8, kind: input, shape index: {}]   ;;  %s5528_s9 = inlined_call_operand.vmem [shape: f32[256,144], index: 9, kind: input, shape index: {}]   ;;  %s5529_s10 = inlined_call_operand.vmem [shape: f32[4,4], index: 10, kind: input, shape index: {}]   ;;  %s5530_s11 = inlined_call_operand.vmem [shape: f32[4,4], index: 11, kind: input, shape index: {}]   ;;  %s5531_s12 = inlined_call_operand.vmem [shape: f32[4,4], index: 12, kind: input, shape index: {}]   ;;  %s5532_s13 = inlined_call_operand.vmem [shape: f32[4,4], index: 13, kind: input, shape index: {}]   ;;  %s5533_s14 = inlined_call_operand.vmem [shape: f32[4,1], index: 14, kind: input, shape index: {}]   ;;  %s5534_s15 = inlined_call_operand.vmem [shape: f32[4,1], index: 15, kind: input, shape index: {}]   ;;  %s5535_s16 = inlined_call_operand.vmem [shape: f32[144,256], index: 16, kind: input, shape index: {}]   ;;  %s5536_s17 = inlined_call_operand.vmem [shape: f32[144,256], index: 17, kind: input, shape index: {}]   ;;  %s5537_s18 = inlined_call_operand.vmem [shape: f32[4,256,40], index: 18, kind: input, shape index: {}]   ;;  %s5538_s19 = inlined_call_operand.vmem [shape: f32[4,256,40], index: 19, kind: input, shape index: {}]   ;;  %s5539_s20 = inlined_call_operand.vmem [shape: f32[4,1], index: 20, kind: input, shape index: {}]   ;;  %s5540_s21 = inlined_call_operand.vmem [shape: f32[4,1], index: 21, kind: input, shape index: {}]   ;;  %s5541_s22 = inlined_call_operand.vmem [shape: f32[40,256], index: 22, kind: input, shape index: {}]   ;;  %s5542_s23 = inlined_call_operand.vmem [shape: f32[40,256], index: 23, kind: input, shape index: {}]   ;;  %s5543_s24 = inlined_call_operand.vmem [shape: f32[4,4], index: 24, kind: input, shape index: {}]   ;;  %s5544_s25 = inlined_call_operand.vmem [shape: f32[2,8,256], index: 25, kind: output, shape index: {0}]   ;;  %s5545_s26 = inlined_call_operand.vmem [shape: f32[2,8,256], index: 26, kind: output, shape index: {1}]  }
   0x1   :  { %5549 = sst [smem:[#allocation2_spill]] %s5519_s0 }
   0x2   :  { %5550 = sst [smem:[#allocation3_spill]] %s5520_s1 }
   0x3   :  { %5551 = sst [smem:[#allocation4_spill]] %s5521_s2 }
   0x4   :  { %5552 = sst [smem:[#allocation5_spill]] %s5522_s3 }
   0x5   :  { %5553 = sst [smem:[#allocation6_spill]] %s5523_s4 }
   0x6   :  { %5554 = sst [smem:[#allocation7_spill]] %s5524_s5 }
   0x7   :  { %5555 = sst [smem:[#allocation8_spill]] %s5525_s6 }
   0x8   :  { %5556 = sst [smem:[#allocation9_spill]] %s5526_s7 }
   0x9   :  { %5557 = sst [smem:[#allocation10_spill]] %s5527_s8 }
   0xa   :  { %5558 = sst [smem:[#allocation11_spill]] %s5528_s9 }
   0xb   :  { %5559 = sst [smem:[#allocation12_spill]] %s5529_s10 }
   0xc LB: > { %s3234_s3 = sadd.s32 4294967295, %s3786_s27   ;;  %p3238_p0 = scmp.ge.s32.totalorder %s3786_s27, 1  ;;  %s3786_s27 = sphi %s3928_s27, %s37_s27  }
   0xd   : > { %p725_p1 = scmp.lt.s32.totalorder %s3786_s27, 3 }
   0xf   : > { %p726_p2 = pnand %p3238_p0, %p725_p1 }
  0x10   : > { %p805_p3 = scmp.lt.s32.totalorder (!%p726_p2), %s3234_s3, 1  ;;  %s5560_s8 = sld [smem:[#allocation9_spill]] (!%p726_p2) }
  0x11   : > { %729 = sbr.rel (%p726_p2) target bundleno = 1378 (0x562), region = 120  ;;  %s5561_s2 = sld [smem:[#allocation3_spill]] (!%p726_p2) }
  0x12   : > { %s5562_s1 = sld [smem:[#allocation2_spill]] (!%p726_p2) }
  0x13   : > { %s5563_s29 = sld [smem:[#allocation5_spill]] (!%p726_p2) }
  0x14   : > { %s5564_s30 = sld [smem:[#allocation4_spill]] (!%p726_p2) }
  0x15   : > { %s5567_s9 = sld [smem:[#allocation8_spill]] (!%p726_p2) }
  0x16   : > { %v3788_v0 = vmov 0.0   ;;  %v994_v1 = vld [vmem:[%s5560_s8] sm:$0xf]  ;;  %s5573_s3 = smov (!%p805_p3, %s3234_s3), 1  ;;  %v3789_v2 = vmov 0   ;;  %vm835_vm0 = vcmask 1043456  }
  0x17   : > { %904 = vmatprep.mubr.f32.mxu0 %v3788_v0  ;;  %984 = vmatprep.mubr.f32.mxu1 %v3788_v0  ;;  %s3472_s4 = sshll.u32 %s5573_s3, 3  ;;  %v1508_v3 = vld [vmem:[%s5533_s14] sm:$0xf]  ;;  %vm831_vm1 = vcmask 31744   ;;  %vm1750_vm2 = vcmask 130048   ;;  %vm2823_vm3 = vcmask 326656  }
  0x18   : > { %3769 = vset.pattern.permute.xlu0 %v3789_v2  ;;  %3770 = vset.pattern.permute.xlu1 %v3789_v2  ;;  %s814_s5 = scalar_lea.vmem %s5561_s2, %s3472_s4  ;;  %s3955_s7 = scalar_lea.vmem %s5562_s1, %s3472_s4 }
  0x19   : > { %997 = vperm.xlu0 %3769, %v994_v1   ;;  %v826_v4 = vld [vmem:[%s814_s5] sm:$0xff]  ;;  %s5565_s5 = sld [smem:[#allocation10_spill]]  ;;  %s5571_s8 = sshll.u32 %s5573_s3, 4 }
  0x1a   : > { %v825_v5 = vld [vmem:[%s3955_s7] sm:$0xff]  ;;  %v830_v6 = vcombine.high %v826_v4, %v826_v4  ;;  %s5566_s1 = sld [smem:[#allocation11_spill]] }
  0x1b   : > { %v3958_v7 = vcombine.high %v825_v5, %v825_v5  ;;  %v828_v8 = vld [vmem:[%s5563_s29] sm:$0xff]  ;;  %s5569_s6 = sld [smem:[#allocation6_spill]] }
  0x1c   : > { %v827_v9 = vld [vmem:[%s5564_s30] sm:$0xff]  ;;  %3247 = vmatprep.subr.msk.mxu0 %vm835_vm0, %v830_v6  ;;  %s5548_s30 = sshll.u32 %s5573_s3, 4 }
  0x1d   : > { %1511 = vperm.xlu0 %3769, %v1508_v3   ;;  %3250 = vmatprep.subr.msk.mxu1 %vm835_vm0, %v3958_v7  ;;  %v993_v13 = vld [vmem:[%s5567_s9] sm:$0xf]  ;;  %s819_s10 = scalar_lea.vmem %s5544_s25, %s5548_s30  ;;  %s5570_s30 = sld [smem:[#allocation7_spill]] }
  0x1e   : > { %3248 = vmatpush1.msk.msra.mxu0 %vm835_vm0, %v826_v4  ;;  %3251 = vmatpush1.msk.msra.mxu1 %vm835_vm0, %v825_v5  ;;  %s824_s9 = scalar_lea.vmem %s5545_s26, %s5571_s8 }
  0x1f   : > { %v1107_v10 = vld [vmem:[%s5565_s5 + $0xf8] sm:$0xff]  ;;  %3249 = vmatmul.mubr.msk.f32.vlgmr.msra.gmra.mxu0 %vm831_vm1, %v828_v8  ;;  %3252 = vmatmul.mubr.msk.f32.vlgmr.msra.gmra.mxu1 %vm831_vm1, %v827_v9  ;;  %v1106_v12 = vld [vmem:[%s5565_s5 + $0xf0] sm:$0xff]  ;;  %v1105_v14 = vld [vmem:[%s5565_s5 + $0xe8] sm:$0xff] }
  0x20   : > { %v1242_v11 = vld [vmem:[%s5566_s1 + $0xf8] sm:$0xff]  ;;  %3253 = vmatprep.subr.msk.mxu0 %vm835_vm0, %v830_v6  ;;  %1067 = vmatprep.mubr.f32.mxu0 %v3788_v0  ;;  %v1241_v15 = vld [vmem:[%s5566_s1 + $0xf0] sm:$0xff]  ;;  %v1104_v16 = vld [vmem:[%s5565_s5 + $0xe0] sm:$0xff] }
  0x21   : > { %3254 = vmatpush1.msk.msra.mxu0 %vm835_vm0, %v826_v4  ;;  %1140 = vmatprep.subr.mxu1 %v1107_v10  ;;  %v1240_v17 = vld [vmem:[%s5566_s1 + $0xe8] sm:$0xff]  ;;  %v1103_v18 = vld [vmem:[%s5565_s5 + $0xd8] sm:$0xff]  ;;  %v1239_v19 = vld [vmem:[%s5566_s1 + $0xe0] sm:$0xff] }
  0x22   : > { %1275 = vmatprep.subr.mxu0 %v1242_v11  ;;  %1141 = vmatpush1.msra.mxu1 %v1106_v12  ;;  %v1102_v20 = vld [vmem:[%s5565_s5 + $0xd0] sm:$0xff]  ;;  %v1238_v21 = vld [vmem:[%s5566_s1 + $0xd8] sm:$0xff]  ;;  %v1101_v22 = vld [vmem:[%s5565_s5 + $0xc8] sm:$0xff] }
  0x23   : > { %3255 = vmatmul.mubr.msk.f32.vlgmr.msra.gmra.mxu0 %vm831_vm1, %v993_v13  ;;  %1142 = vmatprep.subr.mxu1 %v1105_v14  ;;  %v1237_v23 = vld [vmem:[%s5566_s1 + $0xd0] sm:$0xff]  ;;  %v1100_v24 = vld [vmem:[%s5565_s5 + $0xc0] sm:$0xff]  ;;  %v1236_v25 = vld [vmem:[%s5566_s1 + $0xc8] sm:$0xff] }
  0x24   : > { %1276 = vmatpush1.msra.mxu0 %v1241_v15  ;;  %1143 = vmatpush1.msra.mxu1 %v1104_v16  ;;  %v1099_v26 = vld [vmem:[%s5565_s5 + $0xb8] sm:$0xff]  ;;  %v1235_v27 = vld [vmem:[%s5566_s1 + $0xc0] sm:$0xff]  ;;  %v1098_v28 = vld [vmem:[%s5565_s5 + $0xb0] sm:$0xff] }
  0x25   : > { %1277 = vmatprep.subr.mxu0 %v1240_v17  ;;  %1144 = vmatprep.subr.mxu1 %v1103_v18  ;;  %v1234_v29 = vld [vmem:[%s5566_s1 + $0xb8] sm:$0xff]  ;;  %v1097_v30 = vld [vmem:[%s5565_s5 + $0xa8] sm:$0xff]  ;;  %v1233_v31 = vld [vmem:[%s5566_s1 + $0xb0] sm:$0xff] }
  0x26   : > { %1278 = vmatpush1.msra.mxu0 %v1239_v19  ;;  %1145 = vmatpush1.msra.mxu1 %v1102_v20  ;;  %v1096_v32 = vld [vmem:[%s5565_s5 + $0xa0] sm:$0xff]  ;;  %v1232_v33 = vld [vmem:[%s5566_s1 + $0xa8] sm:$0xff]  ;;  %v1095_v34 = vld [vmem:[%s5565_s5 + $0x98] sm:$0xff] }
  0x27   : > { %1279 = vmatprep.subr.mxu0 %v1238_v21  ;;  %1146 = vmatprep.subr.mxu1 %v1101_v22  ;;  %v1231_v35 = vld [vmem:[%s5566_s1 + $0xa0] sm:$0xff]  ;;  %v1094_v36 = vld [vmem:[%s5565_s5 + $0x90] sm:$0xff]  ;;  %v1230_v37 = vld [vmem:[%s5566_s1 + $0x98] sm:$0xff] }
  0x28   : > { %1280 = vmatpush1.msra.mxu0 %v1237_v23  ;;  %1147 = vmatpush1.msra.mxu1 %v1100_v24  ;;  %v1093_v38 = vld [vmem:[%s5565_s5 + $0x88] sm:$0xff]  ;;  %v1229_v39 = vld [vmem:[%s5566_s1 + $0x90] sm:$0xff]  ;;  %v1092_v40 = vld [vmem:[%s5565_s5 + $0x80] sm:$0xff] }
  0x29   : > { %1281 = vmatprep.subr.mxu0 %v1236_v25  ;;  %1148 = vmatprep.subr.mxu1 %v1099_v26  ;;  %v1228_v41 = vld [vmem:[%s5566_s1 + $0x88] sm:$0xff]  ;;  %v1091_v42 = vld [vmem:[%s5565_s5 + $0x78] sm:$0xff]  ;;  %v1227_v43 = vld [vmem:[%s5566_s1 + $0x80] sm:$0xff] }
  0x2a   : > { %1282 = vmatpush1.msra.mxu0 %v1235_v27  ;;  %1149 = vmatpush1.msra.mxu1 %v1098_v28  ;;  %v1090_v44 = vld [vmem:[%s5565_s5 + $0x70] sm:$0xff]  ;;  %v1226_v45 = vld [vmem:[%s5566_s1 + $0x78] sm:$0xff]  ;;  %v1089_v46 = vld [vmem:[%s5565_s5 + $0x68] sm:$0xff] }
  0x2b   : > { %1283 = vmatprep.subr.mxu0 %v1234_v29  ;;  %1150 = vmatprep.subr.mxu1 %v1097_v30  ;;  %v1225_v47 = vld [vmem:[%s5566_s1 + $0x70] sm:$0xff]  ;;  %v1088_v48 = vld [vmem:[%s5565_s5 + $0x60] sm:$0xff]  ;;  %v1224_v49 = vld [vmem:[%s5566_s1 + $0x68] sm:$0xff] }
  0x2c   : > { %1284 = vmatpush1.msra.mxu0 %v1233_v31  ;;  %1151 = vmatpush1.msra.mxu1 %v1096_v32  ;;  %v1087_v50 = vld [vmem:[%s5565_s5 + $0x58] sm:$0xff]  ;;  %v1223_v51 = vld [vmem:[%s5566_s1 + $0x60] sm:$0xff]  ;;  %v1086_v52 = vld [vmem:[%s5565_s5 + $0x50] sm:$0xff] }
  0x2d   : > { %1285 = vmatprep.subr.mxu0 %v1232_v33  ;;  %1152 = vmatprep.subr.mxu1 %v1095_v34  ;;  %v1222_v53 = vld [vmem:[%s5566_s1 + $0x58] sm:$0xff]  ;;  %v1085_v54 = vld [vmem:[%s5565_s5 + $0x48] sm:$0xff]  ;;  %v1221_v55 = vld [vmem:[%s5566_s1 + $0x50] sm:$0xff] }
  0x2e   : > { %1286 = vmatpush1.msra.mxu0 %v1231_v35  ;;  %1153 = vmatpush1.msra.mxu1 %v1094_v36  ;;  %v1084_v56 = vld [vmem:[%s5565_s5 + $0x40] sm:$0xff]  ;;  %v1220_v57 = vld [vmem:[%s5566_s1 + $0x48] sm:$0xff]  ;;  %v1083_v58 = vld [vmem:[%s5565_s5 + $0x38] sm:$0xff] }
  0x2f   : > { %1287 = vmatprep.subr.mxu0 %v1230_v37  ;;  %1154 = vmatprep.subr.mxu1 %v1093_v38  ;;  %v1219_v59 = vld [vmem:[%s5566_s1 + $0x40] sm:$0xff]  ;;  %v1082_v60 = vld [vmem:[%s5565_s5 + $0x30] sm:$0xff]  ;;  %v1218_v61 = vld [vmem:[%s5566_s1 + $0x38] sm:$0xff] }
  0x30   : > { %1288 = vmatpush1.msra.mxu0 %v1229_v39  ;;  %1155 = vmatpush1.msra.mxu1 %v1092_v40  ;;  %v1081_v62 = vld [vmem:[%s5565_s5 + $0x28] sm:$0xff]  ;;  %v1217_v63 = vld [vmem:[%s5566_s1 + $0x30] sm:$0xff]  ;;  %v1080_v1 = vld [vmem:[%s5565_s5 + $0x20] sm:$0xff] }
  0x31   : > { %1289 = vmatprep.subr.mxu0 %v1228_v41  ;;  %1156 = vmatprep.subr.mxu1 %v1091_v42  ;;  %v1216_v3 = vld [vmem:[%s5566_s1 + $0x28] sm:$0xff]  ;;  %v1079_v4 = vld [vmem:[%s5565_s5 + $0x18] sm:$0xff]  ;;  %v1215_v5 = vld [vmem:[%s5566_s1 + $0x20] sm:$0xff] }
  0x32   : > { %1290 = vmatpush1.msra.mxu0 %v1227_v43  ;;  %1157 = vmatpush1.msra.mxu1 %v1090_v44  ;;  %v1078_v6 = vld [vmem:[%s5565_s5 + $0x10] sm:$0xff]  ;;  %v1214_v8 = vld [vmem:[%s5566_s1 + $0x18] sm:$0xff]  ;;  %v1077_v9 = vld [vmem:[%s5565_s5 + $0x8] sm:$0xff] }
  0x33   : > { %1291 = vmatprep.subr.mxu0 %v1226_v45  ;;  %1158 = vmatprep.subr.mxu1 %v1089_v46  ;;  %v1213_v10 = vld [vmem:[%s5566_s1 + $0x10] sm:$0xff]  ;;  %v1076_v11 = vld [vmem:[%s5565_s5] sm:$0xff]  ;;  %v1212_v12 = vld [vmem:[%s5566_s1 + $0x8] sm:$0xff] }
  0x34   : > { %1292 = vmatpush1.msra.mxu0 %v1225_v47  ;;  %1159 = vmatpush1.msra.mxu1 %v1088_v48  ;;  %v1139_v13 = vld [vmem:[%s5565_s5 + $0x1f8] sm:$0xff]  ;;  %v1211_v14 = vld [vmem:[%s5566_s1] sm:$0xff]  ;;  %v1138_v15 = vld [vmem:[%s5565_s5 + $0x1f0] sm:$0xff] }
  0x35   : > { %1293 = vmatprep.subr.mxu0 %v1224_v49  ;;  %1160 = vmatprep.subr.mxu1 %v1087_v50  ;;  %v1274_v16 = vld [vmem:[%s5566_s1 + $0x1f8] sm:$0xff]  ;;  %v1137_v17 = vld [vmem:[%s5565_s5 + $0x1e8] sm:$0xff]  ;;  %v1273_v18 = vld [vmem:[%s5566_s1 + $0x1f0] sm:$0xff] }
  0x36   : > { %1294 = vmatpush1.msra.mxu0 %v1223_v51  ;;  %1161 = vmatpush1.msra.mxu1 %v1086_v52  ;;  %v1136_v19 = vld [vmem:[%s5565_s5 + $0x1e0] sm:$0xff]  ;;  %v1272_v20 = vld [vmem:[%s5566_s1 + $0x1e8] sm:$0xff]  ;;  %v1135_v21 = vld [vmem:[%s5565_s5 + $0x1d8] sm:$0xff] }
  0x37   : > { %1295 = vmatprep.subr.mxu0 %v1222_v53  ;;  %1162 = vmatprep.subr.mxu1 %v1085_v54  ;;  %v1271_v22 = vld [vmem:[%s5566_s1 + $0x1e0] sm:$0xff]  ;;  %v1134_v23 = vld [vmem:[%s5565_s5 + $0x1d0] sm:$0xff]  ;;  %v1270_v24 = vld [vmem:[%s5566_s1 + $0x1d8] sm:$0xff] }
  0x38   : > { %1296 = vmatpush1.msra.mxu0 %v1221_v55  ;;  %1163 = vmatpush1.msra.mxu1 %v1084_v56  ;;  %v1133_v25 = vld [vmem:[%s5565_s5 + $0x1c8] sm:$0xff]  ;;  %v1269_v26 = vld [vmem:[%s5566_s1 + $0x1d0] sm:$0xff]  ;;  %v1132_v27 = vld [vmem:[%s5565_s5 + $0x1c0] sm:$0xff] }
  0x39   : > { %1297 = vmatprep.subr.mxu0 %v1220_v57  ;;  %1164 = vmatprep.subr.mxu1 %v1083_v58  ;;  %v1268_v28 = vld [vmem:[%s5566_s1 + $0x1c8] sm:$0xff]  ;;  %v1131_v29 = vld [vmem:[%s5565_s5 + $0x1b8] sm:$0xff]  ;;  %v1267_v30 = vld [vmem:[%s5566_s1 + $0x1c0] sm:$0xff] }
  0x3a   : > { %1298 = vmatpush1.msra.mxu0 %v1219_v59  ;;  %1165 = vmatpush1.msra.mxu1 %v1082_v60  ;;  %v1130_v31 = vld [vmem:[%s5565_s5 + $0x1b0] sm:$0xff]  ;;  %v1266_v32 = vld [vmem:[%s5566_s1 + $0x1b8] sm:$0xff]  ;;  %v1129_v33 = vld [vmem:[%s5565_s5 + $0x1a8] sm:$0xff] }
  0x3b   : > { %1299 = vmatprep.subr.mxu0 %v1218_v61  ;;  %1166 = vmatprep.subr.mxu1 %v1081_v62  ;;  %v1265_v34 = vld [vmem:[%s5566_s1 + $0x1b0] sm:$0xff]  ;;  %v1128_v35 = vld [vmem:[%s5565_s5 + $0x1a0] sm:$0xff]  ;;  %v1264_v36 = vld [vmem:[%s5566_s1 + $0x1a8] sm:$0xff] }
  0x3c   : > { %1300 = vmatpush1.msra.mxu0 %v1217_v63  ;;  %1167 = vmatpush1.msra.mxu1 %v1080_v1  ;;  %v1127_v37 = vld [vmem:[%s5565_s5 + $0x198] sm:$0xff]  ;;  %v1263_v38 = vld [vmem:[%s5566_s1 + $0x1a0] sm:$0xff]  ;;  %v1126_v39 = vld [vmem:[%s5565_s5 + $0x190] sm:$0xff] }
  0x3d   : > { %1301 = vmatprep.subr.mxu0 %v1216_v3  ;;  %1168 = vmatprep.subr.mxu1 %v1079_v4  ;;  %v1262_v40 = vld [vmem:[%s5566_s1 + $0x198] sm:$0xff]  ;;  %v1125_v41 = vld [vmem:[%s5565_s5 + $0x188] sm:$0xff]  ;;  %v1261_v42 = vld [vmem:[%s5566_s1 + $0x190] sm:$0xff] }
  0x3e   : > { %1302 = vmatpush1.msra.mxu0 %v1215_v5  ;;  %1169 = vmatpush1.msra.mxu1 %v1078_v6  ;;  %v1124_v43 = vld [vmem:[%s5565_s5 + $0x180] sm:$0xff]  ;;  %v1260_v44 = vld [vmem:[%s5566_s1 + $0x188] sm:$0xff]  ;;  %v1123_v45 = vld [vmem:[%s5565_s5 + $0x178] sm:$0xff] }
  0x3f   : > { %1303 = vmatprep.subr.mxu0 %v1214_v8  ;;  %1170 = vmatprep.subr.mxu1 %v1077_v9  ;;  %v1259_v46 = vld [vmem:[%s5566_s1 + $0x180] sm:$0xff]  ;;  %v1122_v47 = vld [vmem:[%s5565_s5 + $0x170] sm:$0xff]  ;;  %v1258_v48 = vld [vmem:[%s5566_s1 + $0x178] sm:$0xff] }
  0x40   : > { %1304 = vmatpush1.msra.mxu0 %v1213_v10  ;;  %1171 = vmatpush1.msra.mxu1 %v1076_v11  ;;  %v1121_v49 = vld [vmem:[%s5565_s5 + $0x168] sm:$0xff]  ;;  %v1257_v50 = vld [vmem:[%s5566_s1 + $0x170] sm:$0xff]  ;;  %v1120_v51 = vld [vmem:[%s5565_s5 + $0x160] sm:$0xff] }
  0x41   : > { %1305 = vmatprep.subr.mxu0 %v1212_v12  ;;  %1172 = vmatprep.subr.mxu1 %v1139_v13  ;;  %v1256_v52 = vld [vmem:[%s5566_s1 + $0x168] sm:$0xff]  ;;  %v1255_v53 = vld [vmem:[%s5566_s1 + $0x160] sm:$0xff]  ;;  %v1119_v54 = vld [vmem:[%s5565_s5 + $0x158] sm:$0xff] }
  0x42   : > { %1306 = vmatpush1.msra.mxu0 %v1211_v14  ;;  %1173 = vmatpush2.msra.mxu1 %v1138_v15  ;;  %v1254_v55 = vld [vmem:[%s5566_s1 + $0x158] sm:$0xff]  ;;  %v1118_v56 = vld [vmem:[%s5565_s5 + $0x150] sm:$0xff]  ;;  %v1117_v58 = vld [vmem:[%s5565_s5 + $0x148] sm:$0xff] }
  0x43   : > { %1307 = vmatprep.subr.mxu0 %v1274_v16  ;;  %1174 = vmatprep.subr.mxu1 %v1137_v17  ;;  %v1253_v57 = vld [vmem:[%s5566_s1 + $0x150] sm:$0xff]  ;;  %v1252_v59 = vld [vmem:[%s5566_s1 + $0x148] sm:$0xff]  ;;  %v1116_v60 = vld [vmem:[%s5565_s5 + $0x140] sm:$0xff] }
  0x44   : > { %1308 = vmatpush2.msra.mxu0 %v1273_v18  ;;  %1175 = vmatpush2.msra.mxu1 %v1136_v19  ;;  %v1251_v61 = vld [vmem:[%s5566_s1 + $0x140] sm:$0xff]  ;;  %v1115_v62 = vld [vmem:[%s5565_s5 + $0x138] sm:$0xff]  ;;  %v1114_v1 = vld [vmem:[%s5565_s5 + $0x130] sm:$0xff] }
  0x45   : > { %1309 = vmatprep.subr.mxu0 %v1272_v20  ;;  %1176 = vmatprep.subr.mxu1 %v1135_v21  ;;  %v1250_v63 = vld [vmem:[%s5566_s1 + $0x138] sm:$0xff]  ;;  %v1249_v3 = vld [vmem:[%s5566_s1 + $0x130] sm:$0xff]  ;;  %v1113_v4 = vld [vmem:[%s5565_s5 + $0x128] sm:$0xff] }
  0x46   : > { %1310 = vmatpush2.msra.mxu0 %v1271_v22  ;;  %1177 = vmatpush2.msra.mxu1 %v1134_v23  ;;  %v1248_v5 = vld [vmem:[%s5566_s1 + $0x128] sm:$0xff]  ;;  %v1112_v6 = vld [vmem:[%s5565_s5 + $0x120] sm:$0xff]  ;;  %v1111_v9 = vld [vmem:[%s5565_s5 + $0x118] sm:$0xff] }
  0x47   : > { %1311 = vmatprep.subr.mxu0 %v1270_v24  ;;  %1178 = vmatprep.subr.mxu1 %v1133_v25  ;;  %v1247_v8 = vld [vmem:[%s5566_s1 + $0x120] sm:$0xff]  ;;  %v1246_v10 = vld [vmem:[%s5566_s1 + $0x118] sm:$0xff]  ;;  %v1110_v11 = vld [vmem:[%s5565_s5 + $0x110] sm:$0xff] }
  0x48   : > { %1312 = vmatpush2.msra.mxu0 %v1269_v26  ;;  %1179 = vmatpush2.msra.mxu1 %v1132_v27  ;;  %v1245_v12 = vld [vmem:[%s5566_s1 + $0x110] sm:$0xff]  ;;  %v1109_v13 = vld [vmem:[%s5565_s5 + $0x108] sm:$0xff]  ;;  %v1108_v15 = vld [vmem:[%s5565_s5 + $0x100] sm:$0xff] }
  0x49   : > { %1313 = vmatprep.subr.mxu0 %v1268_v28  ;;  %1180 = vmatprep.subr.mxu1 %v1131_v29  ;;  %v1244_v14 = vld [vmem:[%s5566_s1 + $0x108] sm:$0xff]  ;;  %v1243_v16 = vld [vmem:[%s5566_s1 + $0x100] sm:$0xff] }
  0x4a   : > { %1314 = vmatpush2.msra.mxu0 %v1267_v30  ;;  %1181 = vmatpush2.msra.mxu1 %v1130_v31  ;;  %v1668_v30 = vld [vmem:[%s5534_s15] sm:$0xf] }
  0x4b   : > { %1315 = vmatprep.subr.mxu0 %v1266_v32  ;;  %1182 = vmatprep.subr.mxu1 %v1129_v33  ;;  %v1899_v31 = vld [vmem:[%s5543_s24] sm:$0xf] }
  0x4c   : > { %1316 = vmatpush2.msra.mxu0 %v1265_v34  ;;  %1183 = vmatpush2.msra.mxu1 %v1128_v35 }
  0x4d   : > { %1317 = vmatprep.subr.mxu0 %v1264_v36  ;;  %1184 = vmatprep.subr.mxu1 %v1127_v37  ;;  %v1347_v36 = vld [vmem:[%s5530_s11] sm:$0xf] }
  0x4e   : > { %1318 = vmatpush2.msra.mxu0 %v1263_v38  ;;  %1185 = vmatpush2.msra.mxu1 %v1126_v39  ;;  %v1519_v38 = vld [vmem:[%s5532_s13] sm:$0xf] }
  0x4f   : > { %1319 = vmatprep.subr.mxu0 %v1262_v40  ;;  %1186 = vmatprep.subr.mxu1 %v1125_v41  ;;  %v1518_v39 = vld [vmem:[%s5531_s12] sm:$0xf]  ;;  %v1709_v40 = vld [vmem:[%s5535_s16 + $0xf8] sm:$0xff] }
  0x50   : > { %1320 = vmatpush2.msra.mxu0 %v1261_v42  ;;  %1187 = vmatpush2.msra.mxu1 %v1124_v43  ;;  %v1745_v41 = vld [vmem:[%s5536_s17 + $0xf8] sm:$0xff]  ;;  %v1708_v42 = vld [vmem:[%s5535_s16 + $0xf0] sm:$0xff] }
  0x51   : > { %1321 = vmatprep.subr.mxu0 %v1260_v44  ;;  %1188 = vmatprep.subr.mxu1 %v1123_v45  ;;  %v1744_v43 = vld [vmem:[%s5536_s17 + $0xf0] sm:$0xff]  ;;  %v1707_v44 = vld [vmem:[%s5535_s16 + $0xe8] sm:$0xff] }
  0x52   : > { %1322 = vmatpush2.msra.mxu0 %v1259_v46  ;;  %1189 = vmatpush2.msra.mxu1 %v1122_v47  ;;  %v1743_v45 = vld [vmem:[%s5536_s17 + $0xe8] sm:$0xff]  ;;  %v1706_v46 = vld [vmem:[%s5535_s16 + $0xe0] sm:$0xff] }
  0x53   : > { %1323 = vmatprep.subr.mxu0 %v1258_v48  ;;  %1190 = vmatprep.subr.mxu1 %v1121_v49  ;;  %v1742_v47 = vld [vmem:[%s5536_s17 + $0xe0] sm:$0xff]  ;;  %v1705_v48 = vld [vmem:[%s5535_s16 + $0xd8] sm:$0xff] }
  0x54   : > { %1324 = vmatpush2.msra.mxu0 %v1257_v50  ;;  %1191 = vmatpush2.msra.mxu1 %v1120_v51  ;;  %v1741_v49 = vld [vmem:[%s5536_s17 + $0xd8] sm:$0xff]  ;;  %v1704_v50 = vld [vmem:[%s5535_s16 + $0xd0] sm:$0xff] }
  0x55   : > { %1325 = vmatprep.subr.mxu0 %v1256_v52  ;;  %1192 = vmatprep.subr.mxu1 %v1119_v54  ;;  %v1740_v51 = vld [vmem:[%s5536_s17 + $0xd0] sm:$0xff]  ;;  %v1703_v52 = vld [vmem:[%s5535_s16 + $0xc8] sm:$0xff]  ;;  %v1702_v54 = vld [vmem:[%s5535_s16 + $0xc0] sm:$0xff] }
  0x56   : > { %1326 = vmatpush2.msra.mxu0 %v1255_v53  ;;  %1193 = vmatpush2.msra.mxu1 %v1118_v56  ;;  %v1739_v53 = vld [vmem:[%s5536_s17 + $0xc8] sm:$0xff]  ;;  %v1701_v56 = vld [vmem:[%s5535_s16 + $0xb8] sm:$0xff] }
  0x57   : > { %1327 = vmatprep.subr.mxu0 %v1254_v55  ;;  %1194 = vmatprep.subr.mxu1 %v1117_v58  ;;  %v1738_v55 = vld [vmem:[%s5536_s17 + $0xc0] sm:$0xff]  ;;  %v1700_v58 = vld [vmem:[%s5535_s16 + $0xb0] sm:$0xff] }
  0x58   : > { %1328 = vmatpush2.msra.mxu0 %v1253_v57  ;;  %1195 = vmatpush2.msra.mxu1 %v1116_v60  ;;  %v1737_v57 = vld [vmem:[%s5536_s17 + $0xb8] sm:$0xff]  ;;  %v1699_v60 = vld [vmem:[%s5535_s16 + $0xa8] sm:$0xff] }
  0x59   : > { %1329 = vmatprep.subr.mxu0 %v1252_v59  ;;  %1196 = vmatprep.subr.mxu1 %v1115_v62  ;;  %v1736_v59 = vld [vmem:[%s5536_s17 + $0xb0] sm:$0xff]  ;;  %v1698_v62 = vld [vmem:[%s5535_s16 + $0xa0] sm:$0xff] }
  0x5a   : > { %1330 = vmatpush2.msra.mxu0 %v1251_v61  ;;  %1197 = vmatpush2.msra.mxu1 %v1114_v1  ;;  %v1735_v61 = vld [vmem:[%s5536_s17 + $0xa8] sm:$0xff]  ;;  %v1697_v1 = vld [vmem:[%s5535_s16 + $0x98] sm:$0xff] }
  0x5b   : > { %1331 = vmatprep.subr.mxu0 %v1250_v63  ;;  %1198 = vmatprep.subr.mxu1 %v1113_v4  ;;  %v1734_v63 = vld [vmem:[%s5536_s17 + $0xa0] sm:$0xff]  ;;  %v1696_v4 = vld [vmem:[%s5535_s16 + $0x90] sm:$0xff] }
  0x5c   : > { %1332 = vmatpush2.msra.mxu0 %v1249_v3  ;;  %1199 = vmatpush2.msra.mxu1 %v1112_v6  ;;  %v1733_v3 = vld [vmem:[%s5536_s17 + $0x98] sm:$0xff]  ;;  %v1695_v6 = vld [vmem:[%s5535_s16 + $0x88] sm:$0xff] }
  0x5d   : > { %1333 = vmatprep.subr.mxu0 %v1248_v5  ;;  %1200 = vmatprep.subr.mxu1 %v1111_v9  ;;  %v1732_v5 = vld [vmem:[%s5536_s17 + $0x90] sm:$0xff]  ;;  %v1694_v9 = vld [vmem:[%s5535_s16 + $0x80] sm:$0xff] }
  0x5e   : > { %1334 = vmatpush2.msra.mxu0 %v1247_v8  ;;  %1201 = vmatpush2.msra.mxu1 %v1110_v11  ;;  %v1731_v8 = vld [vmem:[%s5536_s17 + $0x88] sm:$0xff]  ;;  %v1693_v11 = vld [vmem:[%s5535_s16 + $0x78] sm:$0xff] }
  0x5f   : > { %1335 = vmatprep.subr.mxu0 %v1246_v10  ;;  %1202 = vmatprep.subr.mxu1 %v1109_v13  ;;  %v1730_v10 = vld [vmem:[%s5536_s17 + $0x80] sm:$0xff]  ;;  %v1692_v13 = vld [vmem:[%s5535_s16 + $0x70] sm:$0xff] }
  0x60   : > { %1336 = vmatpush2.msra.mxu0 %v1245_v12  ;;  %1203 = vmatpush2.msra.mxu1 %v1108_v15  ;;  %v1729_v12 = vld [vmem:[%s5536_s17 + $0x78] sm:$0xff]  ;;  %v1691_v15 = vld [vmem:[%s5535_s16 + $0x68] sm:$0xff] }
  0x61   : > { %1337 = vmatprep.subr.mxu0 %v1244_v14  ;;  %1671 = vperm.xlu1 %3770, %v1668_v30   ;;  %v1728_v14 = vld [vmem:[%s5536_s17 + $0x70] sm:$0xff]  ;;  %v1683_v30 = vld [vmem:[%s5535_s16 + $0x28] sm:$0xff] }
  0x62   : > { %1338 = vmatpush2.msra.mxu0 %v1243_v16  ;;  %v1727_v16 = vld [vmem:[%s5536_s17 + $0x68] sm:$0xff] }
  0x65   : > { %2004 = vperm.xlu1 %3770, %v1899_v31   ;;  %v1722_v31 = vld [vmem:[%s5536_s17 + $0x40] sm:$0xff] }
  0x94   : > { %v998_v24 = vpop.permute.xlu0 %997 }
  0xdf   : > { %v906_v17 = vpop.f32.mrf.mxu0  ;;  %v986_v18 = vpop.f32.mrf.mxu1 }
  0xe0   : > { %v987_v19 = vadd.f32 %v986_v18, %v906_v17  ;;  %v1690_v17 = vld [vmem:[%s5535_s16 + $0x60] sm:$0xff] }
  0xe1   : > { %v908_v20 = vpop.f32.mrf.mxu0  ;;  %v988_v21 = vpop.f32.mrf.mxu1  ;;  %v1726_v18 = vld [vmem:[%s5536_s17 + $0x60] sm:$0xff] }
  0xe2   : > { %991 = vst [vmem:[%s819_s10] sm:$0xff] %v987_v19  ;;  %v989_v22 = vadd.f32 %v988_v21, %v908_v20  ;;  %v1689_v19 = vld [vmem:[%s5535_s16 + $0x58] sm:$0xff]  ;;  %v1688_v21 = vld [vmem:[%s5535_s16 + $0x50] sm:$0xff] }
  0xe3   : > { %v1069_v23 = vpop.f32.mrf.mxu0  ;;  %v1725_v20 = vld [vmem:[%s5536_s17 + $0x58] sm:$0xff] }
  0xe4   : > { %992 = vst [vmem:[%s819_s10 + $0x8] sm:$0xff] %v989_v22  ;;  %v1070_v25 = vadd.f32 %v1069_v23, %v998_v24  ;;  %s5568_s10 = sld [smem:[#allocation12_spill]]  ;;  %v1724_v22 = vld [vmem:[%s5536_s17 + $0x50] sm:$0xff]  ;;  %v1687_v23 = vld [vmem:[%s5535_s16 + $0x48] sm:$0xff] }
  0xe5   : > { %v1071_v26 = vpop.f32.mrf.mxu0 }
  0xe6   : > { %v1072_v27 = vadd.f32 %v1071_v26, %v998_v24  ;;  %v4372_v29 = vmax.f32 %v1070_v25, 0.0  ;;  %v1723_v24 = vld [vmem:[%s5536_s17 + $0x48] sm:$0xff]  ;;  %v1686_v25 = vld [vmem:[%s5535_s16 + $0x40] sm:$0xff]  ;;  %v1685_v26 = vld [vmem:[%s5535_s16 + $0x38] sm:$0xff] }
  0xe8   : > { %v4370_v28 = vmax.f32 %v1072_v27, 0.0  ;;  %v1684_v27 = vld [vmem:[%s5535_s16 + $0x30] sm:$0xff] }
  0xea   : > { %1204 = vmatprep.mubr.f32.mxu1 %v4370_v28  ;;  %1339 = vmatprep.mubr.f32.mxu0 %v4370_v28  ;;  %v1346_v37 = vld [vmem:[%s5568_s10] sm:$0xf] }
  0xeb   : > { %1205 = vmatmul.mubr.f32.vlgmr.msra.gmra.mxu1 %v4372_v29  ;;  %1340 = vmatmul.mubr.f32.vlgmr.msra.gmra.mxu0 %v4372_v29 }
  0xec   : > { %1421 = vmatprep.mubr.f32.mxu1 %v3788_v0  ;;  %1501 = vmatprep.mubr.f32.mxu0 %v3788_v0 }
 0x1ab   : > { %v1206_v32 = vpop.f32.mrf.mxu1  ;;  %v1341_v33 = vpop.f32.mrf.mxu0 }
 0x1ad   : > { %v1208_v34 = vpop.f32.mrf.mxu1  ;;  %v1343_v35 = vpop.f32.mrf.mxu0 }
 0x1ae   : > { %3256 = vmatprep.subr.msk.mxu1 %vm835_vm0, %v1343_v35  ;;  %3259 = vmatprep.subr.msk.mxu0 %vm835_vm0, %v1208_v34 }
 0x1af   : > { %3257 = vmatpush1.msk.msra.mxu1 %vm835_vm0, %v1341_v33  ;;  %3260 = vmatpush1.msk.msra.mxu0 %vm835_vm0, %v1206_v32 }
 0x1b0   : > { %3258 = vmatmul.mubr.msk.f32.vlgmr.msra.gmra.mxu1 %vm831_vm1, %v1347_v36  ;;  %3261 = vmatmul.mubr.msk.f32.vlgmr.msra.gmra.mxu0 %vm831_vm1, %v1346_v37  ;;  %v1680_v36 = vld [vmem:[%s5535_s16 + $0x10] sm:$0xff]  ;;  %v1719_v37 = vld [vmem:[%s5536_s17 + $0x28] sm:$0xff] }
 0x1b1   : > { %3262 = vmatprep.subr.msk.mxu1 %vm835_vm0, %v1343_v35  ;;  %3265 = vmatprep.subr.msk.mxu0 %vm835_vm0, %v1208_v34  ;;  %v1681_v34 = vld [vmem:[%s5535_s16 + $0x18] sm:$0xff]  ;;  %v1720_v35 = vld [vmem:[%s5536_s17 + $0x30] sm:$0xff] }
 0x1b2   : > { %3263 = vmatpush1.msk.msra.mxu1 %vm835_vm0, %v1341_v33  ;;  %3266 = vmatpush1.msk.msra.mxu0 %vm835_vm0, %v1206_v32  ;;  %v1682_v32 = vld [vmem:[%s5535_s16 + $0x20] sm:$0xff]  ;;  %v1721_v33 = vld [vmem:[%s5536_s17 + $0x38] sm:$0xff] }
 0x1b3   : > { %1587 = vmatprep.mubr.f32.mxu1 %v3788_v0  ;;  %1661 = vmatprep.mubr.f32.mxu0 %v3788_v0 }
 0x1b4   : > { %3264 = vmatmul.mubr.msk.f32.vlgmr.msra.gmra.mxu1 %vm831_vm1, %v1519_v38  ;;  %3267 = vmatmul.mubr.msk.f32.vlgmr.msra.gmra.mxu0 %vm831_vm1, %v1518_v39  ;;  %v1679_v38 = vld [vmem:[%s5535_s16 + $0x8] sm:$0xff]  ;;  %v1718_v39 = vld [vmem:[%s5536_s17 + $0x20] sm:$0xff] }
 0x1b5   : > { %1828 = vmatprep.subr.mxu0 %v1709_v40  ;;  %1754 = vmatprep.subr.mxu1 %v1745_v41  ;;  %v1678_v40 = vld [vmem:[%s5535_s16] sm:$0xff]  ;;  %v1717_v41 = vld [vmem:[%s5536_s17 + $0x18] sm:$0xff] }
 0x1b6   : > { %1829 = vmatpush1.msra.mxu0 %v1708_v42  ;;  %1755 = vmatpush1.msra.mxu1 %v1744_v43  ;;  %v1713_v42 = vld [vmem:[%s5535_s16 + $0x118] sm:$0xff]  ;;  %v1716_v43 = vld [vmem:[%s5536_s17 + $0x10] sm:$0xff] }
 0x1b7   : > { %1830 = vmatprep.subr.mxu0 %v1707_v44  ;;  %1756 = vmatprep.subr.mxu1 %v1743_v45  ;;  %v1712_v44 = vld [vmem:[%s5535_s16 + $0x110] sm:$0xff]  ;;  %v1715_v45 = vld [vmem:[%s5536_s17 + $0x8] sm:$0xff] }
 0x1b8   : > { %1831 = vmatpush1.msra.mxu0 %v1706_v46  ;;  %1757 = vmatpush1.msra.mxu1 %v1742_v47  ;;  %v1711_v46 = vld [vmem:[%s5535_s16 + $0x108] sm:$0xff]  ;;  %v1714_v47 = vld [vmem:[%s5536_s17] sm:$0xff] }
 0x1b9   : > { %1832 = vmatprep.subr.mxu0 %v1705_v48  ;;  %1758 = vmatprep.subr.mxu1 %v1741_v49  ;;  %v1710_v48 = vld [vmem:[%s5535_s16 + $0x100] sm:$0xff]  ;;  %v1749_v49 = vld [vmem:[%s5536_s17 + $0x118] sm:$0xff] }
 0x1ba   : > { %1833 = vmatpush1.msra.mxu0 %v1704_v50  ;;  %1759 = vmatpush1.msra.mxu1 %v1740_v51  ;;  %v2044_v50 = vld [vmem:[%s5538_s19 + $0xf8] sm:$0xff]  ;;  %v1748_v51 = vld [vmem:[%s5536_s17 + $0x110] sm:$0xff] }
 0x1bb   : > { %1834 = vmatprep.subr.mxu0 %v1703_v52  ;;  %1760 = vmatprep.subr.mxu1 %v1739_v53  ;;  %v1747_v52 = vld [vmem:[%s5536_s17 + $0x108] sm:$0xff]  ;;  %v1746_v53 = vld [vmem:[%s5536_s17 + $0x100] sm:$0xff] }
 0x1bc   : > { %1835 = vmatpush1.msra.mxu0 %v1702_v54  ;;  %1761 = vmatpush1.msra.mxu1 %v1738_v55  ;;  %v1931_v54 = vld [vmem:[%s5537_s18 + $0xf8] sm:$0xff] }
 0x1bd   : > { %1836 = vmatprep.subr.mxu0 %v1701_v56  ;;  %1762 = vmatprep.subr.mxu1 %v1737_v57 }
 0x1be   : > { %1837 = vmatpush1.msra.mxu0 %v1700_v58  ;;  %1763 = vmatpush1.msra.mxu1 %v1736_v59 }
 0x1bf   : > { %1838 = vmatprep.subr.mxu0 %v1699_v60  ;;  %1764 = vmatprep.subr.mxu1 %v1735_v61  ;;  %v1512_v60 = vpop.permute.xlu0 %1511 }
 0x1c0   : > { %1839 = vmatpush1.msra.mxu0 %v1698_v62  ;;  %1765 = vmatpush1.msra.mxu1 %v1734_v63 }
 0x1c1   : > { %1840 = vmatprep.subr.mxu0 %v1697_v1  ;;  %1766 = vmatprep.subr.mxu1 %v1733_v3 }
 0x1c2   : > { %1841 = vmatpush1.msra.mxu0 %v1696_v4  ;;  %1767 = vmatpush1.msra.mxu1 %v1732_v5 }
 0x1c3   : > { %1842 = vmatprep.subr.mxu0 %v1695_v6  ;;  %1768 = vmatprep.subr.mxu1 %v1731_v8 }
 0x1c4   : > { %1843 = vmatpush1.msra.mxu0 %v1694_v9  ;;  %1769 = vmatpush1.msra.mxu1 %v1730_v10  ;;  %v1672_v9 = vpop.permute.xlu1 %1671 }
 0x1c5   : > { %1844 = vmatprep.subr.mxu0 %v1693_v11  ;;  %1770 = vmatprep.subr.mxu1 %v1729_v12 }
 0x1c6   : > { %1845 = vmatpush1.msra.mxu0 %v1692_v13  ;;  %1771 = vmatpush1.msra.mxu1 %v1728_v14  ;;  %v2028_v13 = vld [vmem:[%s5538_s19 + $0x78] sm:$0xff] }
 0x1c7   : > { %1846 = vmatprep.subr.mxu0 %v1691_v15  ;;  %1772 = vmatprep.subr.mxu1 %v1727_v16  ;;  %v2043_v15 = vld [vmem:[%s5538_s19 + $0xf0] sm:$0xff] }
 0x1c8   : > { %1847 = vmatpush1.msra.mxu0 %v1690_v17  ;;  %1773 = vmatpush1.msra.mxu1 %v1726_v18  ;;  %v2027_v16 = vld [vmem:[%s5538_s19 + $0x70] sm:$0xff]  ;;  %v2042_v18 = vld [vmem:[%s5538_s19 + $0xe8] sm:$0xff] }
 0x1c9   : > { %1848 = vmatprep.subr.mxu0 %v1689_v19  ;;  %1774 = vmatprep.subr.mxu1 %v1725_v20  ;;  %v1915_v20 = vld [vmem:[%s5537_s18 + $0x78] sm:$0xff] }
 0x1ca   : > { %1849 = vmatpush1.msra.mxu0 %v1688_v21  ;;  %1775 = vmatpush1.msra.mxu1 %v1724_v22  ;;  %v2026_v21 = vld [vmem:[%s5538_s19 + $0x68] sm:$0xff]  ;;  %v1930_v22 = vld [vmem:[%s5537_s18 + $0xf0] sm:$0xff] }
 0x1cb   : > { %1850 = vmatprep.subr.mxu0 %v1687_v23  ;;  %1776 = vmatprep.subr.mxu1 %v1723_v24  ;;  %v2041_v23 = vld [vmem:[%s5538_s19 + $0xe0] sm:$0xff]  ;;  %v1914_v24 = vld [vmem:[%s5537_s18 + $0x70] sm:$0xff] }
 0x1cc   : > { %1851 = vmatpush1.msra.mxu0 %v1686_v25  ;;  %1777 = vmatpush1.msra.mxu1 %v1722_v31  ;;  %v2025_v25 = vld [vmem:[%s5538_s19 + $0x60] sm:$0xff]  ;;  %v2024_v31 = vld [vmem:[%s5538_s19 + $0x58] sm:$0xff] }
 0x1cd   : > { %1852 = vmatprep.subr.mxu0 %v1685_v26  ;;  %1778 = vmatprep.subr.mxu1 %v1721_v33  ;;  %v1929_v26 = vld [vmem:[%s5537_s18 + $0xe8] sm:$0xff]  ;;  %v2039_v33 = vld [vmem:[%s5538_s19 + $0xd0] sm:$0xff] }
 0x1ce   : > { %1853 = vmatpush1.msra.mxu0 %v1684_v27  ;;  %1779 = vmatpush1.msra.mxu1 %v1720_v35  ;;  %v2040_v27 = vld [vmem:[%s5538_s19 + $0xd8] sm:$0xff]  ;;  %v2023_v35 = vld [vmem:[%s5538_s19 + $0x50] sm:$0xff] }
 0x1cf   : > { %1854 = vmatprep.subr.mxu0 %v1683_v30  ;;  %1780 = vmatprep.subr.mxu1 %v1719_v37  ;;  %v1913_v30 = vld [vmem:[%s5537_s18 + $0x68] sm:$0xff] }
 0x1d0   : > { %1855 = vmatpush1.msra.mxu0 %v1682_v32  ;;  %1781 = vmatpush1.msra.mxu1 %v1718_v39  ;;  %v1928_v32 = vld [vmem:[%s5537_s18 + $0xe0] sm:$0xff]  ;;  %v2038_v37 = vld [vmem:[%s5538_s19 + $0xc8] sm:$0xff] }
 0x1d1   : > { %1856 = vmatprep.subr.mxu0 %v1681_v34  ;;  %1782 = vmatprep.subr.mxu1 %v1717_v41  ;;  %v1912_v34 = vld [vmem:[%s5537_s18 + $0x60] sm:$0xff]  ;;  %v2022_v39 = vld [vmem:[%s5538_s19 + $0x48] sm:$0xff] }
 0x1d2   : > { %1857 = vmatpush1.msra.mxu0 %v1680_v36  ;;  %1783 = vmatpush1.msra.mxu1 %v1716_v43  ;;  %v1927_v36 = vld [vmem:[%s5537_s18 + $0xd8] sm:$0xff]  ;;  %v2037_v41 = vld [vmem:[%s5538_s19 + $0xc0] sm:$0xff] }
 0x1d3   : > { %1858 = vmatprep.subr.mxu0 %v1679_v38  ;;  %1784 = vmatprep.subr.mxu1 %v1715_v45  ;;  %v1911_v38 = vld [vmem:[%s5537_s18 + $0x58] sm:$0xff]  ;;  %v2021_v43 = vld [vmem:[%s5538_s19 + $0x40] sm:$0xff] }
 0x1d4   : > { %1859 = vmatpush1.msra.mxu0 %v1678_v40  ;;  %1785 = vmatpush1.msra.mxu1 %v1714_v47  ;;  %v1926_v40 = vld [vmem:[%s5537_s18 + $0xd0] sm:$0xff]  ;;  %v2036_v45 = vld [vmem:[%s5538_s19 + $0xb8] sm:$0xff] }
 0x1d5   : > { %1888 = vmatprep.subr.mxu0 %v1713_v42  ;;  %1814 = vmatprep.subr.mxu1 %v1749_v49  ;;  %v1910_v42 = vld [vmem:[%s5537_s18 + $0x50] sm:$0xff]  ;;  %v2020_v47 = vld [vmem:[%s5538_s19 + $0x38] sm:$0xff] }
 0x1d6   : > { %1889 = vmatpush2.msra.mxu0 %v1712_v44  ;;  %1815 = vmatpush2.msra.mxu1 %v1748_v51  ;;  %v1925_v44 = vld [vmem:[%s5537_s18 + $0xc8] sm:$0xff]  ;;  %v2035_v49 = vld [vmem:[%s5538_s19 + $0xb0] sm:$0xff] }
 0x1d7   : > { %1890 = vmatprep.subr.mxu0 %v1711_v46  ;;  %1816 = vmatprep.subr.mxu1 %v1747_v52  ;;  %v1909_v46 = vld [vmem:[%s5537_s18 + $0x48] sm:$0xff]  ;;  %v2019_v51 = vld [vmem:[%s5538_s19 + $0x30] sm:$0xff]  ;;  %v1923_v52 = vld [vmem:[%s5537_s18 + $0xb8] sm:$0xff] }
 0x1d8   : > { %1891 = vmatpush2.msra.mxu0 %v1710_v48  ;;  %1817 = vmatpush2.msra.mxu1 %v1746_v53  ;;  %v1924_v48 = vld [vmem:[%s5537_s18 + $0xc0] sm:$0xff]  ;;  %v2034_v53 = vld [vmem:[%s5538_s19 + $0xa8] sm:$0xff] }
 0x1d9   : > { %3511 = vmatprep.subr.mxu0 %v2044_v50  ;;  %3476 = vmatprep.subr.mxu1 %v1931_v54  ;;  %v1908_v50 = vld [vmem:[%s5537_s18 + $0x40] sm:$0xff]  ;;  %v1907_v54 = vld [vmem:[%s5537_s18 + $0x38] sm:$0xff] }
 0x270   : > { %v1423_v55 = vpop.f32.mrf.mxu1  ;;  %v1503_v56 = vpop.f32.mrf.mxu0 }
 0x271   : > { %v1504_v57 = vadd.f32 %v1503_v56, %v1423_v55  ;;  %v2018_v55 = vld [vmem:[%s5538_s19 + $0x28] sm:$0xff]  ;;  %v1922_v56 = vld [vmem:[%s5537_s18 + $0xb0] sm:$0xff] }
 0x272   : > { %v1425_v58 = vpop.f32.mrf.mxu1  ;;  %v1505_v59 = vpop.f32.mrf.mxu0 }
 0x273   : > { %v1506_v61 = vadd.f32 %v1505_v59, %v1425_v58  ;;  %v1514_v62 = vadd.f32 %v1512_v60, %v1504_v57  ;;  %v2033_v57 = vld [vmem:[%s5538_s19 + $0xa0] sm:$0xff]  ;;  %v1906_v58 = vld [vmem:[%s5537_s18 + $0x30] sm:$0xff] }
 0x274   : > { %v1589_v63 = vpop.f32.mrf.mxu1  ;;  %v1663_v1 = vpop.f32.mrf.mxu0  ;;  %v2017_v59 = vld [vmem:[%s5538_s19 + $0x20] sm:$0xff] }
 0x275   : > { %v1515_v3 = vadd.f32 %v1512_v60, %v1506_v61  ;;  %v1664_v4 = vadd.f32 %v1663_v1, %v1589_v63  ;;  %v1516_v11 = vmax.f32 %v1514_v62, 0.0  ;;  %v1921_v60 = vld [vmem:[%s5537_s18 + $0xa8] sm:$0xff]  ;;  %v2032_v61 = vld [vmem:[%s5538_s19 + $0x98] sm:$0xff]  ;;  %v1920_v1 = vld [vmem:[%s5537_s18 + $0xa0] sm:$0xff] }
 0x276   : > { %v1591_v5 = vpop.f32.mrf.mxu1  ;;  %v1665_v6 = vpop.f32.mrf.mxu0  ;;  %v1905_v62 = vld [vmem:[%s5537_s18 + $0x28] sm:$0xff]  ;;  %v2016_v63 = vld [vmem:[%s5538_s19 + $0x18] sm:$0xff] }
 0x277   : > { %v1517_v8 = vmax.f32 %v1515_v3, 0.0  ;;  %v1666_v10 = vadd.f32 %v1665_v6, %v1591_v5  ;;  %v1674_v12 = vadd.f32 %v1672_v9, %v1664_v4  ;;  %v2031_v3 = vld [vmem:[%s5538_s19 + $0x90] sm:$0xff]  ;;  %v1904_v4 = vld [vmem:[%s5537_s18 + $0x20] sm:$0xff]  ;;  %v1919_v6 = vld [vmem:[%s5537_s18 + $0x98] sm:$0xff] }
 0x278   : > { %v2015_v5 = vld [vmem:[%s5538_s19 + $0x10] sm:$0xff] }
 0x279   : > { %v1675_v14 = vadd.f32 %v1672_v9, %v1666_v10  ;;  %3269 = vmatprep.mubr.msk.f32.mxu0 %vm1750_vm2, %v1517_v8  ;;  %v1676_v19 = vmax.f32 %v1674_v12, 0.0  ;;  %v2030_v8 = vld [vmem:[%s5538_s19 + $0x88] sm:$0xff]  ;;  %v1903_v9 = vld [vmem:[%s5537_s18 + $0x18] sm:$0xff]  ;;  %v2029_v12 = vld [vmem:[%s5538_s19 + $0x80] sm:$0xff] }
 0x27a   : > { %1893 = vmatmul.mubr.f32.vlgmr.msra.gmra.mxu0 %v1516_v11  ;;  %v2014_v10 = vld [vmem:[%s5538_s19 + $0x8] sm:$0xff]  ;;  %v1918_v11 = vld [vmem:[%s5537_s18 + $0x90] sm:$0xff] }
 0x27b   : > { %v1677_v17 = vmax.f32 %v1675_v14, 0.0  ;;  %3512 = vmatpush3.msra.mxu0 %v2028_v13  ;;  %2109 = vmatprep.mubr.f32.mxu0 %v4370_v28  ;;  %v1902_v13 = vld [vmem:[%s5537_s18 + $0x10] sm:$0xff]  ;;  %v2013_v14 = vld [vmem:[%s5538_s19] sm:$0xff] }
 0x27c   : > { %3513 = vmatprep.subr.mxu0 %v2043_v15  ;;  %v1917_v15 = vld [vmem:[%s5537_s18 + $0x88] sm:$0xff] }
 0x27d   : > { %3514 = vmatpush3.msra.mxu0 %v2027_v16  ;;  %3268 = vmatprep.mubr.msk.f32.mxu1 %vm1750_vm2, %v1677_v17  ;;  %v3333_v16 = vld [vmem:[%s5538_s19 + $0x1f8] sm:$0xff]  ;;  %v1901_v17 = vld [vmem:[%s5537_s18 + $0x8] sm:$0xff] }
 0x27e   : > { %3515 = vmatprep.subr.mxu0 %v2042_v18  ;;  %1819 = vmatmul.mubr.f32.vlgmr.msra.gmra.mxu1 %v1676_v19  ;;  %v3317_v18 = vld [vmem:[%s5538_s19 + $0x178] sm:$0xff]  ;;  %v1916_v19 = vld [vmem:[%s5537_s18 + $0x80] sm:$0xff] }
 0x27f   : > { %3477 = vmatpush3.msra.mxu1 %v1915_v20  ;;  %3516 = vmatpush3.msra.mxu0 %v2026_v21  ;;  %v3332_v20 = vld [vmem:[%s5538_s19 + $0x1f0] sm:$0xff]  ;;  %v1900_v21 = vld [vmem:[%s5537_s18] sm:$0xff] }
 0x280   : > { %3478 = vmatprep.subr.mxu1 %v1930_v22  ;;  %1996 = vmatprep.mubr.f32.mxu1 %v4370_v28  ;;  %v3316_v22 = vld [vmem:[%s5538_s19 + $0x170] sm:$0xff] }
 0x281   : > { %3517 = vmatprep.subr.mxu0 %v2041_v23  ;;  %3479 = vmatpush3.msra.mxu1 %v1914_v24  ;;  %v3301_v23 = vld [vmem:[%s5537_s18 + $0x1f8] sm:$0xff]  ;;  %v3331_v24 = vld [vmem:[%s5538_s19 + $0x1e8] sm:$0xff] }
 0x282   : > { %3518 = vmatpush3.msra.mxu0 %v2025_v25  ;;  %3480 = vmatprep.subr.mxu1 %v1929_v26  ;;  %v3285_v25 = vld [vmem:[%s5537_s18 + $0x178] sm:$0xff]  ;;  %v3315_v26 = vld [vmem:[%s5538_s19 + $0x168] sm:$0xff] }
 0x283   : > { %3519 = vmatprep.subr.mxu0 %v2040_v27  ;;  %3481 = vmatpush3.msra.mxu1 %v1913_v30  ;;  %v3300_v27 = vld [vmem:[%s5537_s18 + $0x1f0] sm:$0xff]  ;;  %v3330_v30 = vld [vmem:[%s5538_s19 + $0x1e0] sm:$0xff] }
 0x284   : > { %3520 = vmatpush3.msra.mxu0 %v2024_v31  ;;  %3482 = vmatprep.subr.mxu1 %v1928_v32  ;;  %v3284_v31 = vld [vmem:[%s5537_s18 + $0x170] sm:$0xff]  ;;  %v3314_v32 = vld [vmem:[%s5538_s19 + $0x160] sm:$0xff] }
 0x285   : > { %3521 = vmatprep.subr.mxu0 %v2039_v33  ;;  %3483 = vmatpush3.msra.mxu1 %v1912_v34  ;;  %v3299_v33 = vld [vmem:[%s5537_s18 + $0x1e8] sm:$0xff]  ;;  %v3329_v34 = vld [vmem:[%s5538_s19 + $0x1d8] sm:$0xff] }
 0x286   : > { %3522 = vmatpush3.msra.mxu0 %v2023_v35  ;;  %3484 = vmatprep.subr.mxu1 %v1927_v36  ;;  %v3283_v35 = vld [vmem:[%s5537_s18 + $0x168] sm:$0xff]  ;;  %v3313_v36 = vld [vmem:[%s5538_s19 + $0x158] sm:$0xff] }
 0x287   : > { %3523 = vmatprep.subr.mxu0 %v2038_v37  ;;  %3485 = vmatpush3.msra.mxu1 %v1911_v38  ;;  %v3298_v37 = vld [vmem:[%s5537_s18 + $0x1e0] sm:$0xff]  ;;  %v3328_v38 = vld [vmem:[%s5538_s19 + $0x1d0] sm:$0xff] }
 0x288   : > { %3524 = vmatpush3.msra.mxu0 %v2022_v39  ;;  %3486 = vmatprep.subr.mxu1 %v1926_v40  ;;  %v3282_v39 = vld [vmem:[%s5537_s18 + $0x160] sm:$0xff]  ;;  %v3312_v40 = vld [vmem:[%s5538_s19 + $0x150] sm:$0xff] }
 0x289   : > { %3525 = vmatprep.subr.mxu0 %v2037_v41  ;;  %3487 = vmatpush3.msra.mxu1 %v1910_v42  ;;  %v3297_v41 = vld [vmem:[%s5537_s18 + $0x1d8] sm:$0xff]  ;;  %v3327_v42 = vld [vmem:[%s5538_s19 + $0x1c8] sm:$0xff] }
 0x28a   : > { %3526 = vmatpush3.msra.mxu0 %v2021_v43  ;;  %3488 = vmatprep.subr.mxu1 %v1925_v44  ;;  %v3281_v43 = vld [vmem:[%s5537_s18 + $0x158] sm:$0xff]  ;;  %v3311_v44 = vld [vmem:[%s5538_s19 + $0x148] sm:$0xff] }
 0x28b   : > { %3527 = vmatprep.subr.mxu0 %v2036_v45  ;;  %3489 = vmatpush3.msra.mxu1 %v1909_v46  ;;  %v3296_v45 = vld [vmem:[%s5537_s18 + $0x1d0] sm:$0xff]  ;;  %v3326_v46 = vld [vmem:[%s5538_s19 + $0x1c0] sm:$0xff] }
 0x28c   : > { %3528 = vmatpush3.msra.mxu0 %v2020_v47  ;;  %3490 = vmatprep.subr.mxu1 %v1924_v48  ;;  %v3280_v47 = vld [vmem:[%s5537_s18 + $0x150] sm:$0xff]  ;;  %v3310_v48 = vld [vmem:[%s5538_s19 + $0x140] sm:$0xff] }
 0x28d   : > { %3529 = vmatprep.subr.mxu0 %v2035_v49  ;;  %3491 = vmatpush3.msra.mxu1 %v1908_v50  ;;  %v3295_v49 = vld [vmem:[%s5537_s18 + $0x1c8] sm:$0xff]  ;;  %v3325_v50 = vld [vmem:[%s5538_s19 + $0x1b8] sm:$0xff] }
 0x28e   : > { %3530 = vmatpush3.msra.mxu0 %v2019_v51  ;;  %3492 = vmatprep.subr.mxu1 %v1923_v52  ;;  %v3279_v51 = vld [vmem:[%s5537_s18 + $0x148] sm:$0xff]  ;;  %v3309_v52 = vld [vmem:[%s5538_s19 + $0x138] sm:$0xff] }
 0x28f   : > { %3531 = vmatprep.subr.mxu0 %v2034_v53  ;;  %3493 = vmatpush3.msra.mxu1 %v1907_v54  ;;  %v3294_v53 = vld [vmem:[%s5537_s18 + $0x1c0] sm:$0xff]  ;;  %v3324_v54 = vld [vmem:[%s5538_s19 + $0x1b0] sm:$0xff] }
 0x290   : > { %3532 = vmatpush3.msra.mxu0 %v2018_v55  ;;  %3494 = vmatprep.subr.mxu1 %v1922_v56  ;;  %v3278_v55 = vld [vmem:[%s5537_s18 + $0x140] sm:$0xff]  ;;  %v3308_v56 = vld [vmem:[%s5538_s19 + $0x130] sm:$0xff] }
 0x291   : > { %3533 = vmatprep.subr.mxu0 %v2033_v57  ;;  %3495 = vmatpush3.msra.mxu1 %v1906_v58  ;;  %v3293_v57 = vld [vmem:[%s5537_s18 + $0x1b8] sm:$0xff]  ;;  %v3323_v58 = vld [vmem:[%s5538_s19 + $0x1a8] sm:$0xff] }
 0x292   : > { %3534 = vmatpush3.msra.mxu0 %v2017_v59  ;;  %3496 = vmatprep.subr.mxu1 %v1921_v60  ;;  %v3277_v59 = vld [vmem:[%s5537_s18 + $0x138] sm:$0xff]  ;;  %v3307_v60 = vld [vmem:[%s5538_s19 + $0x128] sm:$0xff] }
 0x293   : > { %3535 = vmatprep.subr.mxu0 %v2032_v61  ;;  %3497 = vmatpush3.msra.mxu1 %v1905_v62  ;;  %v3292_v61 = vld [vmem:[%s5537_s18 + $0x1b0] sm:$0xff]  ;;  %v3322_v62 = vld [vmem:[%s5538_s19 + $0x1a0] sm:$0xff] }
 0x294   : > { %3536 = vmatpush3.msra.mxu0 %v2016_v63  ;;  %3498 = vmatprep.subr.mxu1 %v1920_v1  ;;  %v3276_v63 = vld [vmem:[%s5537_s18 + $0x130] sm:$0xff]  ;;  %v3306_v1 = vld [vmem:[%s5538_s19 + $0x120] sm:$0xff] }
 0x295   : > { %3537 = vmatprep.subr.mxu0 %v2031_v3  ;;  %3499 = vmatpush3.msra.mxu1 %v1904_v4  ;;  %v3291_v3 = vld [vmem:[%s5537_s18 + $0x1a8] sm:$0xff]  ;;  %v3321_v4 = vld [vmem:[%s5538_s19 + $0x198] sm:$0xff] }
 0x296   : > { %3538 = vmatpush3.msra.mxu0 %v2015_v5  ;;  %3500 = vmatprep.subr.mxu1 %v1919_v6  ;;  %v3275_v5 = vld [vmem:[%s5537_s18 + $0x128] sm:$0xff]  ;;  %v3305_v6 = vld [vmem:[%s5538_s19 + $0x118] sm:$0xff] }
 0x297   : > { %3539 = vmatprep.subr.mxu0 %v2030_v8  ;;  %3501 = vmatpush3.msra.mxu1 %v1903_v9  ;;  %v3290_v8 = vld [vmem:[%s5537_s18 + $0x1a0] sm:$0xff]  ;;  %v3320_v9 = vld [vmem:[%s5538_s19 + $0x190] sm:$0xff] }
 0x298   : > { %3540 = vmatpush3.msra.mxu0 %v2014_v10  ;;  %3502 = vmatprep.subr.mxu1 %v1918_v11  ;;  %v3274_v10 = vld [vmem:[%s5537_s18 + $0x120] sm:$0xff]  ;;  %v3304_v11 = vld [vmem:[%s5538_s19 + $0x110] sm:$0xff] }
 0x299   : > { %3541 = vmatprep.subr.mxu0 %v2029_v12  ;;  %3503 = vmatpush3.msra.mxu1 %v1902_v13  ;;  %v3289_v12 = vld [vmem:[%s5537_s18 + $0x198] sm:$0xff]  ;;  %v3319_v13 = vld [vmem:[%s5538_s19 + $0x188] sm:$0xff] }
 0x29a   : > { %3542 = vmatpush3.msra.mxu0 %v2013_v14  ;;  %3504 = vmatprep.subr.mxu1 %v1917_v15  ;;  %v3273_v14 = vld [vmem:[%s5537_s18 + $0x118] sm:$0xff]  ;;  %v3303_v15 = vld [vmem:[%s5538_s19 + $0x108] sm:$0xff] }
 0x29b   : > { %2110 = vmatmul.mubr.f32.vlgmr.msra.gmra.mxu0 %v4372_v29  ;;  %3581 = vmatprep.subr.mxu0 %v3333_v16  ;;  %v3288_v16 = vld [vmem:[%s5537_s18 + $0x190] sm:$0xff] }
 0x29c   : > { %3505 = vmatpush3.msra.mxu1 %v1901_v17  ;;  %3582 = vmatpush3.msra.mxu0 %v3317_v18  ;;  %v3318_v17 = vld [vmem:[%s5538_s19 + $0x180] sm:$0xff]  ;;  %v3272_v18 = vld [vmem:[%s5537_s18 + $0x110] sm:$0xff] }
 0x29d   : > { %2331 = vmatprep.mubr.f32.mxu0 %v4370_v28  ;;  %3506 = vmatprep.subr.mxu1 %v1916_v19  ;;  %v3302_v19 = vld [vmem:[%s5538_s19 + $0x100] sm:$0xff] }
 0x29e   : > { %3583 = vmatprep.subr.mxu0 %v3332_v20  ;;  %3507 = vmatpush3.msra.mxu1 %v1900_v21  ;;  %v3287_v20 = vld [vmem:[%s5537_s18 + $0x188] sm:$0xff]  ;;  %v3397_v21 = vld [vmem:[%s5538_s19 + $0x2f8] sm:$0xff] }
 0x29f   : > { %3584 = vmatpush3.msra.mxu0 %v3316_v22  ;;  %1997 = vmatmul.mubr.f32.vlgmr.msra.gmra.mxu1 %v4372_v29  ;;  %v3271_v22 = vld [vmem:[%s5537_s18 + $0x108] sm:$0xff] }
 0x2a0   : > { %3546 = vmatprep.subr.mxu1 %v3301_v23  ;;  %3585 = vmatprep.subr.mxu0 %v3331_v24  ;;  %v3381_v23 = vld [vmem:[%s5538_s19 + $0x278] sm:$0xff]  ;;  %v3286_v24 = vld [vmem:[%s5537_s18 + $0x180] sm:$0xff] }
 0x2a1   : > { %3547 = vmatpush3.msra.mxu1 %v3285_v25  ;;  %2218 = vmatprep.mubr.f32.mxu1 %v4370_v28  ;;  %v3396_v25 = vld [vmem:[%s5538_s19 + $0x2f0] sm:$0xff] }
 0x2a2   : > { %3586 = vmatpush3.msra.mxu0 %v3315_v26  ;;  %3548 = vmatprep.subr.mxu1 %v3300_v27  ;;  %v3270_v26 = vld [vmem:[%s5537_s18 + $0x100] sm:$0xff]  ;;  %v3380_v27 = vld [vmem:[%s5538_s19 + $0x270] sm:$0xff] }
 0x2a3   : > { %3587 = vmatprep.subr.mxu0 %v3330_v30  ;;  %3549 = vmatpush3.msra.mxu1 %v3284_v31  ;;  %v3365_v30 = vld [vmem:[%s5537_s18 + $0x2f8] sm:$0xff]  ;;  %v3395_v31 = vld [vmem:[%s5538_s19 + $0x2e8] sm:$0xff] }
 0x2a4   : > { %3588 = vmatpush3.msra.mxu0 %v3314_v32  ;;  %3550 = vmatprep.subr.mxu1 %v3299_v33  ;;  %v3349_v32 = vld [vmem:[%s5537_s18 + $0x278] sm:$0xff]  ;;  %v3379_v33 = vld [vmem:[%s5538_s19 + $0x268] sm:$0xff] }
 0x2a5   : > { %3589 = vmatprep.subr.mxu0 %v3329_v34  ;;  %3551 = vmatpush3.msra.mxu1 %v3283_v35  ;;  %v3364_v34 = vld [vmem:[%s5537_s18 + $0x2f0] sm:$0xff]  ;;  %v3394_v35 = vld [vmem:[%s5538_s19 + $0x2e0] sm:$0xff] }
 0x2a6   : > { %3590 = vmatpush3.msra.mxu0 %v3313_v36  ;;  %3552 = vmatprep.subr.mxu1 %v3298_v37  ;;  %v3348_v36 = vld [vmem:[%s5537_s18 + $0x270] sm:$0xff]  ;;  %v3378_v37 = vld [vmem:[%s5538_s19 + $0x260] sm:$0xff] }
 0x2a7   : > { %3591 = vmatprep.subr.mxu0 %v3328_v38  ;;  %3553 = vmatpush3.msra.mxu1 %v3282_v39  ;;  %v3363_v38 = vld [vmem:[%s5537_s18 + $0x2e8] sm:$0xff]  ;;  %v3393_v39 = vld [vmem:[%s5538_s19 + $0x2d8] sm:$0xff] }
 0x2a8   : > { %3592 = vmatpush3.msra.mxu0 %v3312_v40  ;;  %3554 = vmatprep.subr.mxu1 %v3297_v41  ;;  %v3347_v40 = vld [vmem:[%s5537_s18 + $0x268] sm:$0xff]  ;;  %v3377_v41 = vld [vmem:[%s5538_s19 + $0x258] sm:$0xff] }
 0x2a9   : > { %3593 = vmatprep.subr.mxu0 %v3327_v42  ;;  %3555 = vmatpush3.msra.mxu1 %v3281_v43  ;;  %v3362_v42 = vld [vmem:[%s5537_s18 + $0x2e0] sm:$0xff]  ;;  %v3392_v43 = vld [vmem:[%s5538_s19 + $0x2d0] sm:$0xff] }
 0x2aa   : > { %3594 = vmatpush3.msra.mxu0 %v3311_v44  ;;  %3556 = vmatprep.subr.mxu1 %v3296_v45  ;;  %v3346_v44 = vld [vmem:[%s5537_s18 + $0x260] sm:$0xff]  ;;  %v3376_v45 = vld [vmem:[%s5538_s19 + $0x250] sm:$0xff] }
 0x2ab   : > { %3595 = vmatprep.subr.mxu0 %v3326_v46  ;;  %3557 = vmatpush3.msra.mxu1 %v3280_v47  ;;  %v3361_v46 = vld [vmem:[%s5537_s18 + $0x2d8] sm:$0xff]  ;;  %v3391_v47 = vld [vmem:[%s5538_s19 + $0x2c8] sm:$0xff] }
 0x2ac   : > { %3596 = vmatpush3.msra.mxu0 %v3310_v48  ;;  %3558 = vmatprep.subr.mxu1 %v3295_v49  ;;  %v3345_v48 = vld [vmem:[%s5537_s18 + $0x258] sm:$0xff]  ;;  %v3375_v49 = vld [vmem:[%s5538_s19 + $0x248] sm:$0xff] }
 0x2ad   : > { %3597 = vmatprep.subr.mxu0 %v3325_v50  ;;  %3559 = vmatpush3.msra.mxu1 %v3279_v51  ;;  %v3360_v50 = vld [vmem:[%s5537_s18 + $0x2d0] sm:$0xff]  ;;  %v3390_v51 = vld [vmem:[%s5538_s19 + $0x2c0] sm:$0xff] }
 0x2ae   : > { %3598 = vmatpush3.msra.mxu0 %v3309_v52  ;;  %3560 = vmatprep.subr.mxu1 %v3294_v53  ;;  %v3344_v52 = vld [vmem:[%s5537_s18 + $0x250] sm:$0xff]  ;;  %v3374_v53 = vld [vmem:[%s5538_s19 + $0x240] sm:$0xff] }
 0x2af   : > { %3599 = vmatprep.subr.mxu0 %v3324_v54  ;;  %3561 = vmatpush3.msra.mxu1 %v3278_v55  ;;  %v3359_v54 = vld [vmem:[%s5537_s18 + $0x2c8] sm:$0xff]  ;;  %v3389_v55 = vld [vmem:[%s5538_s19 + $0x2b8] sm:$0xff] }
 0x2b0   : > { %3600 = vmatpush3.msra.mxu0 %v3308_v56  ;;  %3562 = vmatprep.subr.mxu1 %v3293_v57  ;;  %v3343_v56 = vld [vmem:[%s5537_s18 + $0x248] sm:$0xff]  ;;  %v3373_v57 = vld [vmem:[%s5538_s19 + $0x238] sm:$0xff] }
 0x2b1   : > { %3601 = vmatprep.subr.mxu0 %v3323_v58  ;;  %3563 = vmatpush3.msra.mxu1 %v3277_v59  ;;  %v3358_v58 = vld [vmem:[%s5537_s18 + $0x2c0] sm:$0xff]  ;;  %v3388_v59 = vld [vmem:[%s5538_s19 + $0x2b0] sm:$0xff] }
 0x2b2   : > { %3602 = vmatpush3.msra.mxu0 %v3307_v60  ;;  %3564 = vmatprep.subr.mxu1 %v3292_v61  ;;  %v3342_v60 = vld [vmem:[%s5537_s18 + $0x240] sm:$0xff]  ;;  %v3372_v61 = vld [vmem:[%s5538_s19 + $0x230] sm:$0xff] }
 0x2b3   : > { %3603 = vmatprep.subr.mxu0 %v3322_v62  ;;  %3565 = vmatpush3.msra.mxu1 %v3276_v63  ;;  %v3357_v62 = vld [vmem:[%s5537_s18 + $0x2b8] sm:$0xff]  ;;  %v3387_v63 = vld [vmem:[%s5538_s19 + $0x2a8] sm:$0xff] }
 0x2b4   : > { %3604 = vmatpush3.msra.mxu0 %v3306_v1  ;;  %3566 = vmatprep.subr.mxu1 %v3291_v3  ;;  %v3341_v1 = vld [vmem:[%s5537_s18 + $0x238] sm:$0xff]  ;;  %v3371_v3 = vld [vmem:[%s5538_s19 + $0x228] sm:$0xff] }
 0x2b5   : > { %3605 = vmatprep.subr.mxu0 %v3321_v4  ;;  %3567 = vmatpush3.msra.mxu1 %v3275_v5  ;;  %v3356_v4 = vld [vmem:[%s5537_s18 + $0x2b0] sm:$0xff]  ;;  %v3386_v5 = vld [vmem:[%s5538_s19 + $0x2a0] sm:$0xff] }
 0x2b6   : > { %3606 = vmatpush3.msra.mxu0 %v3305_v6  ;;  %3568 = vmatprep.subr.mxu1 %v3290_v8  ;;  %v3340_v6 = vld [vmem:[%s5537_s18 + $0x230] sm:$0xff]  ;;  %v3370_v8 = vld [vmem:[%s5538_s19 + $0x220] sm:$0xff] }
 0x2b7   : > { %3607 = vmatprep.subr.mxu0 %v3320_v9  ;;  %3569 = vmatpush3.msra.mxu1 %v3274_v10  ;;  %v3355_v9 = vld [vmem:[%s5537_s18 + $0x2a8] sm:$0xff]  ;;  %v3385_v10 = vld [vmem:[%s5538_s19 + $0x298] sm:$0xff] }
 0x2b8   : > { %3608 = vmatpush3.msra.mxu0 %v3304_v11  ;;  %3570 = vmatprep.subr.mxu1 %v3289_v12  ;;  %v3339_v11 = vld [vmem:[%s5537_s18 + $0x228] sm:$0xff]  ;;  %v3369_v12 = vld [vmem:[%s5538_s19 + $0x218] sm:$0xff] }
 0x2b9   : > { %3609 = vmatprep.subr.mxu0 %v3319_v13  ;;  %3571 = vmatpush3.msra.mxu1 %v3273_v14  ;;  %v3354_v13 = vld [vmem:[%s5537_s18 + $0x2a0] sm:$0xff]  ;;  %v3384_v14 = vld [vmem:[%s5538_s19 + $0x290] sm:$0xff] }
 0x2ba   : > { %3610 = vmatpush3.msra.mxu0 %v3303_v15  ;;  %3572 = vmatprep.subr.mxu1 %v3288_v16  ;;  %v3338_v15 = vld [vmem:[%s5537_s18 + $0x220] sm:$0xff]  ;;  %v3368_v16 = vld [vmem:[%s5538_s19 + $0x210] sm:$0xff] }
 0x2bb   : > { %3611 = vmatprep.subr.mxu0 %v3318_v17  ;;  %3573 = vmatpush3.msra.mxu1 %v3272_v18  ;;  %v3353_v17 = vld [vmem:[%s5537_s18 + $0x298] sm:$0xff]  ;;  %v3383_v18 = vld [vmem:[%s5538_s19 + $0x288] sm:$0xff] }
 0x2bc   : > { %3612 = vmatpush3.msra.mxu0 %v3302_v19  ;;  %3574 = vmatprep.subr.mxu1 %v3287_v20  ;;  %v3337_v19 = vld [vmem:[%s5537_s18 + $0x218] sm:$0xff]  ;;  %v3367_v20 = vld [vmem:[%s5538_s19 + $0x208] sm:$0xff] }
 0x2bd   : > { %2332 = vmatmul.mubr.f32.vlgmr.msra.gmra.mxu0 %v4372_v29  ;;  %3651 = vmatprep.subr.mxu0 %v3397_v21  ;;  %v3352_v21 = vld [vmem:[%s5537_s18 + $0x290] sm:$0xff] }
 0x2be   : > { %3575 = vmatpush3.msra.mxu1 %v3271_v22  ;;  %3652 = vmatpush3.msra.mxu0 %v3381_v23  ;;  %v3382_v22 = vld [vmem:[%s5538_s19 + $0x280] sm:$0xff]  ;;  %v3336_v23 = vld [vmem:[%s5537_s18 + $0x210] sm:$0xff] }
 0x2bf   : > { %2553 = vmatprep.mubr.f32.mxu0 %v4370_v28  ;;  %3576 = vmatprep.subr.mxu1 %v3286_v24  ;;  %v3366_v24 = vld [vmem:[%s5538_s19 + $0x200] sm:$0xff] }
 0x2c0   : > { %3653 = vmatprep.subr.mxu0 %v3396_v25  ;;  %3577 = vmatpush3.msra.mxu1 %v3270_v26  ;;  %v3351_v25 = vld [vmem:[%s5537_s18 + $0x288] sm:$0xff]  ;;  %v3461_v26 = vld [vmem:[%s5538_s19 + $0x3f8] sm:$0xff] }
 0x2c1   : > { %3654 = vmatpush3.msra.mxu0 %v3380_v27  ;;  %2219 = vmatmul.mubr.f32.vlgmr.msra.gmra.mxu1 %v4372_v29  ;;  %v3335_v27 = vld [vmem:[%s5537_s18 + $0x208] sm:$0xff] }
 0x2c2   : > { %3616 = vmatprep.subr.mxu1 %v3365_v30  ;;  %3655 = vmatprep.subr.mxu0 %v3395_v31  ;;  %v3445_v30 = vld [vmem:[%s5538_s19 + $0x378] sm:$0xff]  ;;  %v3350_v31 = vld [vmem:[%s5537_s18 + $0x280] sm:$0xff] }
 0x2c3   : > { %3617 = vmatpush3.msra.mxu1 %v3349_v32  ;;  %2440 = vmatprep.mubr.f32.mxu1 %v4370_v28  ;;  %v3460_v32 = vld [vmem:[%s5538_s19 + $0x3f0] sm:$0xff] }
 0x2c4   : > { %3656 = vmatpush3.msra.mxu0 %v3379_v33  ;;  %3618 = vmatprep.subr.mxu1 %v3364_v34  ;;  %v3334_v33 = vld [vmem:[%s5537_s18 + $0x200] sm:$0xff]  ;;  %v3444_v34 = vld [vmem:[%s5538_s19 + $0x370] sm:$0xff] }
 0x2c5   : > { %3657 = vmatprep.subr.mxu0 %v3394_v35  ;;  %3619 = vmatpush3.msra.mxu1 %v3348_v36  ;;  %v3429_v35 = vld [vmem:[%s5537_s18 + $0x3f8] sm:$0xff]  ;;  %v3459_v36 = vld [vmem:[%s5538_s19 + $0x3e8] sm:$0xff] }
 0x2c6   : > { %3658 = vmatpush3.msra.mxu0 %v3378_v37  ;;  %3620 = vmatprep.subr.mxu1 %v3363_v38  ;;  %v3413_v37 = vld [vmem:[%s5537_s18 + $0x378] sm:$0xff]  ;;  %v3443_v38 = vld [vmem:[%s5538_s19 + $0x368] sm:$0xff] }
 0x2c7   : > { %3659 = vmatprep.subr.mxu0 %v3393_v39  ;;  %3621 = vmatpush3.msra.mxu1 %v3347_v40  ;;  %v3428_v39 = vld [vmem:[%s5537_s18 + $0x3f0] sm:$0xff]  ;;  %v3458_v40 = vld [vmem:[%s5538_s19 + $0x3e0] sm:$0xff] }
 0x2c8   : > { %3660 = vmatpush3.msra.mxu0 %v3377_v41  ;;  %3622 = vmatprep.subr.mxu1 %v3362_v42  ;;  %v3412_v41 = vld [vmem:[%s5537_s18 + $0x370] sm:$0xff]  ;;  %v3442_v42 = vld [vmem:[%s5538_s19 + $0x360] sm:$0xff] }
 0x2c9   : > { %3661 = vmatprep.subr.mxu0 %v3392_v43  ;;  %3623 = vmatpush3.msra.mxu1 %v3346_v44  ;;  %v3427_v43 = vld [vmem:[%s5537_s18 + $0x3e8] sm:$0xff]  ;;  %v3457_v44 = vld [vmem:[%s5538_s19 + $0x3d8] sm:$0xff] }
 0x2ca   : > { %3662 = vmatpush3.msra.mxu0 %v3376_v45  ;;  %3624 = vmatprep.subr.mxu1 %v3361_v46  ;;  %v3411_v45 = vld [vmem:[%s5537_s18 + $0x368] sm:$0xff]  ;;  %v3441_v46 = vld [vmem:[%s5538_s19 + $0x358] sm:$0xff] }
 0x2cb   : > { %3663 = vmatprep.subr.mxu0 %v3391_v47  ;;  %3625 = vmatpush3.msra.mxu1 %v3345_v48  ;;  %v3426_v47 = vld [vmem:[%s5537_s18 + $0x3e0] sm:$0xff]  ;;  %v3456_v48 = vld [vmem:[%s5538_s19 + $0x3d0] sm:$0xff] }
 0x2cc   : > { %3664 = vmatpush3.msra.mxu0 %v3375_v49  ;;  %3626 = vmatprep.subr.mxu1 %v3360_v50  ;;  %v3410_v49 = vld [vmem:[%s5537_s18 + $0x360] sm:$0xff]  ;;  %v3440_v50 = vld [vmem:[%s5538_s19 + $0x350] sm:$0xff] }
 0x2cd   : > { %3665 = vmatprep.subr.mxu0 %v3390_v51  ;;  %3627 = vmatpush3.msra.mxu1 %v3344_v52  ;;  %v3425_v51 = vld [vmem:[%s5537_s18 + $0x3d8] sm:$0xff]  ;;  %v3455_v52 = vld [vmem:[%s5538_s19 + $0x3c8] sm:$0xff] }
 0x2ce   : > { %3666 = vmatpush3.msra.mxu0 %v3374_v53  ;;  %3628 = vmatprep.subr.mxu1 %v3359_v54  ;;  %v3409_v53 = vld [vmem:[%s5537_s18 + $0x358] sm:$0xff]  ;;  %v3439_v54 = vld [vmem:[%s5538_s19 + $0x348] sm:$0xff] }
 0x2cf   : > { %3667 = vmatprep.subr.mxu0 %v3389_v55  ;;  %3629 = vmatpush3.msra.mxu1 %v3343_v56  ;;  %v3424_v55 = vld [vmem:[%s5537_s18 + $0x3d0] sm:$0xff]  ;;  %v3454_v56 = vld [vmem:[%s5538_s19 + $0x3c0] sm:$0xff] }
 0x2d0   : > { %3668 = vmatpush3.msra.mxu0 %v3373_v57  ;;  %3630 = vmatprep.subr.mxu1 %v3358_v58  ;;  %v3408_v57 = vld [vmem:[%s5537_s18 + $0x350] sm:$0xff]  ;;  %v3438_v58 = vld [vmem:[%s5538_s19 + $0x340] sm:$0xff] }
 0x2d1   : > { %3669 = vmatprep.subr.mxu0 %v3388_v59  ;;  %3631 = vmatpush3.msra.mxu1 %v3342_v60  ;;  %v3423_v59 = vld [vmem:[%s5537_s18 + $0x3c8] sm:$0xff]  ;;  %v3453_v60 = vld [vmem:[%s5538_s19 + $0x3b8] sm:$0xff] }
 0x2d2   : > { %3670 = vmatpush3.msra.mxu0 %v3372_v61  ;;  %3632 = vmatprep.subr.mxu1 %v3357_v62  ;;  %v3407_v61 = vld [vmem:[%s5537_s18 + $0x348] sm:$0xff]  ;;  %v3437_v62 = vld [vmem:[%s5538_s19 + $0x338] sm:$0xff] }
 0x2d3   : > { %3671 = vmatprep.subr.mxu0 %v3387_v63  ;;  %3633 = vmatpush3.msra.mxu1 %v3341_v1  ;;  %v3422_v63 = vld [vmem:[%s5537_s18 + $0x3c0] sm:$0xff]  ;;  %v3452_v1 = vld [vmem:[%s5538_s19 + $0x3b0] sm:$0xff] }
 0x2d4   : > { %3672 = vmatpush3.msra.mxu0 %v3371_v3  ;;  %3634 = vmatprep.subr.mxu1 %v3356_v4  ;;  %v3406_v3 = vld [vmem:[%s5537_s18 + $0x340] sm:$0xff]  ;;  %v3436_v4 = vld [vmem:[%s5538_s19 + $0x330] sm:$0xff] }
 0x2d5   : > { %3673 = vmatprep.subr.mxu0 %v3386_v5  ;;  %3635 = vmatpush3.msra.mxu1 %v3340_v6  ;;  %v3421_v5 = vld [vmem:[%s5537_s18 + $0x3b8] sm:$0xff]  ;;  %v3451_v6 = vld [vmem:[%s5538_s19 + $0x3a8] sm:$0xff] }
 0x2d6   : > { %3674 = vmatpush3.msra.mxu0 %v3370_v8  ;;  %3636 = vmatprep.subr.mxu1 %v3355_v9  ;;  %v3405_v8 = vld [vmem:[%s5537_s18 + $0x338] sm:$0xff]  ;;  %v3435_v9 = vld [vmem:[%s5538_s19 + $0x328] sm:$0xff] }
 0x2d7   : > { %3675 = vmatprep.subr.mxu0 %v3385_v10  ;;  %3637 = vmatpush3.msra.mxu1 %v3339_v11  ;;  %v3420_v10 = vld [vmem:[%s5537_s18 + $0x3b0] sm:$0xff]  ;;  %v3450_v11 = vld [vmem:[%s5538_s19 + $0x3a0] sm:$0xff] }
 0x2d8   : > { %3676 = vmatpush3.msra.mxu0 %v3369_v12  ;;  %3638 = vmatprep.subr.mxu1 %v3354_v13  ;;  %v3404_v12 = vld [vmem:[%s5537_s18 + $0x330] sm:$0xff]  ;;  %v3434_v13 = vld [vmem:[%s5538_s19 + $0x320] sm:$0xff] }
 0x2d9   : > { %3677 = vmatprep.subr.mxu0 %v3384_v14  ;;  %3639 = vmatpush3.msra.mxu1 %v3338_v15  ;;  %v3419_v14 = vld [vmem:[%s5537_s18 + $0x3a8] sm:$0xff]  ;;  %v3449_v15 = vld [vmem:[%s5538_s19 + $0x398] sm:$0xff] }
 0x2da   : > { %3678 = vmatpush3.msra.mxu0 %v3368_v16  ;;  %3640 = vmatprep.subr.mxu1 %v3353_v17  ;;  %v3403_v16 = vld [vmem:[%s5537_s18 + $0x328] sm:$0xff]  ;;  %v3433_v17 = vld [vmem:[%s5538_s19 + $0x318] sm:$0xff] }
 0x2db   : > { %3679 = vmatprep.subr.mxu0 %v3383_v18  ;;  %3641 = vmatpush3.msra.mxu1 %v3337_v19  ;;  %v3418_v18 = vld [vmem:[%s5537_s18 + $0x3a0] sm:$0xff]  ;;  %v3448_v19 = vld [vmem:[%s5538_s19 + $0x390] sm:$0xff] }
 0x2dc   : > { %3680 = vmatpush3.msra.mxu0 %v3367_v20  ;;  %3642 = vmatprep.subr.mxu1 %v3352_v21  ;;  %v3402_v20 = vld [vmem:[%s5537_s18 + $0x320] sm:$0xff]  ;;  %v3432_v21 = vld [vmem:[%s5538_s19 + $0x310] sm:$0xff] }
 0x2dd   : > { %3681 = vmatprep.subr.mxu0 %v3382_v22  ;;  %3643 = vmatpush3.msra.mxu1 %v3336_v23  ;;  %v3417_v22 = vld [vmem:[%s5537_s18 + $0x398] sm:$0xff]  ;;  %v3447_v23 = vld [vmem:[%s5538_s19 + $0x388] sm:$0xff] }
 0x2de   : > { %3682 = vmatpush3.msra.mxu0 %v3366_v24  ;;  %3644 = vmatprep.subr.mxu1 %v3351_v25  ;;  %v3401_v24 = vld [vmem:[%s5537_s18 + $0x318] sm:$0xff]  ;;  %v3431_v25 = vld [vmem:[%s5538_s19 + $0x308] sm:$0xff] }
 0x2df   : > { %2554 = vmatmul.mubr.f32.vlgmr.msra.gmra.mxu0 %v4372_v29  ;;  %3721 = vmatprep.subr.mxu0 %v3461_v26  ;;  %v3416_v26 = vld [vmem:[%s5537_s18 + $0x390] sm:$0xff] }
 0x2e0   : > { %3645 = vmatpush3.msra.mxu1 %v3335_v27  ;;  %3722 = vmatpush3.msra.mxu0 %v3445_v30  ;;  %v3446_v27 = vld [vmem:[%s5538_s19 + $0x380] sm:$0xff]  ;;  %v3400_v30 = vld [vmem:[%s5537_s18 + $0x310] sm:$0xff] }
 0x2e1   : > { %2775 = vmatprep.mubr.f32.mxu0 %v4370_v28  ;;  %3646 = vmatprep.subr.mxu1 %v3350_v31  ;;  %v3430_v31 = vld [vmem:[%s5538_s19 + $0x300] sm:$0xff] }
 0x2e2   : > { %3723 = vmatprep.subr.mxu0 %v3460_v32  ;;  %3647 = vmatpush3.msra.mxu1 %v3334_v33  ;;  %v3415_v32 = vld [vmem:[%s5537_s18 + $0x388] sm:$0xff] }
 0x2e3   : > { %3724 = vmatpush3.msra.mxu0 %v3444_v34  ;;  %2441 = vmatmul.mubr.f32.vlgmr.msra.gmra.mxu1 %v4372_v29  ;;  %v3399_v33 = vld [vmem:[%s5537_s18 + $0x308] sm:$0xff]  ;;  %v3414_v34 = vld [vmem:[%s5537_s18 + $0x380] sm:$0xff] }
 0x2e4   : > { %3686 = vmatprep.subr.mxu1 %v3429_v35  ;;  %3725 = vmatprep.subr.mxu0 %v3459_v36  ;;  %v3398_v35 = vld [vmem:[%s5537_s18 + $0x300] sm:$0xff]  ;;  %v3790_v36 = vmov 1  }
 0x2e5   : > { %3687 = vmatpush3.msra.mxu1 %v3413_v37  ;;  %2662 = vmatprep.mubr.f32.mxu1 %v4370_v28  ;;  %v3778_v37 = vld [vmem:[%s5543_s24] sm:$0xf] }
 0x2e6   : > { %3726 = vmatpush3.msra.mxu0 %v3443_v38  ;;  %3688 = vmatprep.subr.mxu1 %v3428_v39  ;;  %v3791_v38 = vmov 2   ;;  %v2787_v39 = vld [vmem:[%s5539_s20] sm:$0xf] }
 0x2e7   : > { %3727 = vmatprep.subr.mxu0 %v3458_v40  ;;  %3689 = vmatpush3.msra.mxu1 %v3412_v41  ;;  %v3792_v40 = vmov 3   ;;  %v2795_v41 = vld [vmem:[%s5540_s21] sm:$0xf] }
 0x2e8   : > { %3728 = vmatpush3.msra.mxu0 %v3442_v42  ;;  %3690 = vmatprep.subr.mxu1 %v3427_v43 }
 0x2e9   : > { %3729 = vmatprep.subr.mxu0 %v3457_v44  ;;  %3691 = vmatpush3.msra.mxu1 %v3411_v45 }
 0x2ea   : > { %3730 = vmatpush3.msra.mxu0 %v3441_v46  ;;  %3692 = vmatprep.subr.mxu1 %v3426_v47 }
 0x2eb   : > { %3731 = vmatprep.subr.mxu0 %v3456_v48  ;;  %3693 = vmatpush3.msra.mxu1 %v3410_v49  ;;  %v2822_v48 = vld [vmem:[%s5542_s23 + $0x48] sm:$0xff]  ;;  %v2821_v49 = vld [vmem:[%s5542_s23 + $0x40] sm:$0xff] }
 0x2ec   : > { %3732 = vmatpush3.msra.mxu0 %v3440_v50  ;;  %3694 = vmatprep.subr.mxu1 %v3425_v51  ;;  %v2819_v50 = vld [vmem:[%s5542_s23 + $0x30] sm:$0xff]  ;;  %v2818_v51 = vld [vmem:[%s5542_s23 + $0x28] sm:$0xff] }
 0x2ed   : > { %3733 = vmatprep.subr.mxu0 %v3455_v52  ;;  %3695 = vmatpush3.msra.mxu1 %v3409_v53  ;;  %v2812_v52 = vld [vmem:[%s5541_s22 + $0x48] sm:$0xff]  ;;  %v2817_v53 = vld [vmem:[%s5542_s23 + $0x20] sm:$0xff] }
 0x2ee   : > { %3734 = vmatpush3.msra.mxu0 %v3439_v54  ;;  %3696 = vmatprep.subr.mxu1 %v3424_v55  ;;  %v2811_v54 = vld [vmem:[%s5541_s22 + $0x40] sm:$0xff]  ;;  %v2816_v55 = vld [vmem:[%s5542_s23 + $0x18] sm:$0xff] }
 0x2ef   : > { %3735 = vmatprep.subr.mxu0 %v3454_v56  ;;  %3697 = vmatpush3.msra.mxu1 %v3408_v57  ;;  %v2810_v56 = vld [vmem:[%s5541_s22 + $0x38] sm:$0xff]  ;;  %v2815_v57 = vld [vmem:[%s5542_s23 + $0x10] sm:$0xff] }
 0x2f0   : > { %3736 = vmatpush3.msra.mxu0 %v3438_v58  ;;  %3698 = vmatprep.subr.mxu1 %v3423_v59  ;;  %v2809_v58 = vld [vmem:[%s5541_s22 + $0x30] sm:$0xff]  ;;  %v2814_v59 = vld [vmem:[%s5542_s23 + $0x8] sm:$0xff] }
 0x2f1   : > { %3737 = vmatprep.subr.mxu0 %v3453_v60  ;;  %3699 = vmatpush3.msra.mxu1 %v3407_v61  ;;  %v2808_v60 = vld [vmem:[%s5541_s22 + $0x28] sm:$0xff]  ;;  %v2813_v61 = vld [vmem:[%s5542_s23] sm:$0xff] }
 0x2f2   : > { %3738 = vmatpush3.msra.mxu0 %v3437_v62  ;;  %3700 = vmatprep.subr.mxu1 %v3422_v63  ;;  %v2807_v62 = vld [vmem:[%s5541_s22 + $0x20] sm:$0xff]  ;;  %v2806_v63 = vld [vmem:[%s5541_s22 + $0x18] sm:$0xff] }
 0x2f3   : > { %3739 = vmatprep.subr.mxu0 %v3452_v1  ;;  %3701 = vmatpush3.msra.mxu1 %v3406_v3  ;;  %v2805_v1 = vld [vmem:[%s5541_s22 + $0x10] sm:$0xff]  ;;  %v2804_v3 = vld [vmem:[%s5541_s22 + $0x8] sm:$0xff] }
 0x2f4   : > { %3740 = vmatpush3.msra.mxu0 %v3436_v4  ;;  %3702 = vmatprep.subr.mxu1 %v3421_v5  ;;  %v2803_v4 = vld [vmem:[%s5541_s22] sm:$0xff] }
 0x2f5   : > { %3741 = vmatprep.subr.mxu0 %v3451_v6  ;;  %3703 = vmatpush3.msra.mxu1 %v3405_v8 }
 0x2f6   : > { %3742 = vmatpush3.msra.mxu0 %v3435_v9  ;;  %3704 = vmatprep.subr.mxu1 %v3420_v10 }
 0x2f7   : > { %3743 = vmatprep.subr.mxu0 %v3450_v11  ;;  %3705 = vmatpush3.msra.mxu1 %v3404_v12 }
 0x2f8   : > { %3744 = vmatpush3.msra.mxu0 %v3434_v13  ;;  %3706 = vmatprep.subr.mxu1 %v3419_v14  ;;  %v2007_v13 = vlaneseq }
 0x2f9   : > { %3745 = vmatprep.subr.mxu0 %v3449_v15  ;;  %3707 = vmatpush3.msra.mxu1 %v3403_v16 }
 0x2fa   : > { %3746 = vmatpush3.msra.mxu0 %v3433_v17  ;;  %3708 = vmatprep.subr.mxu1 %v3418_v18  ;;  %v2008_v16 = vshrl.u32 %v2007_v13, 7 }
 0x2fb   : > { %3747 = vmatprep.subr.mxu0 %v3448_v19  ;;  %3709 = vmatpush3.msra.mxu1 %v3402_v20  ;;  %v2005_v20 = vpop.permute.xlu1 %2004 }
 0x2fc   : > { %3748 = vmatpush3.msra.mxu0 %v3432_v21  ;;  %3710 = vmatprep.subr.mxu1 %v3417_v22  ;;  %v2009_v21 = vsub.s32 0, %v2008_v16 }
 0x2fd   : > { %3749 = vmatprep.subr.mxu0 %v3447_v23  ;;  %3711 = vmatpush3.msra.mxu1 %v3401_v24 }
 0x2fe   : > { %3750 = vmatpush3.msra.mxu0 %v3431_v25  ;;  %3712 = vmatprep.subr.mxu1 %v3416_v26 }
 0x2ff   : > { %3751 = vmatprep.subr.mxu0 %v3446_v27  ;;  %3713 = vmatpush3.msra.mxu1 %v3400_v30 }
 0x300   : > { %3752 = vmatpush3.msra.mxu0 %v3430_v31  ;;  %3714 = vmatprep.subr.mxu1 %v3415_v32 }
 0x301   : > { %2776 = vmatmul.mubr.f32.vlgmr.msra.gmra.mxu0 %v4372_v29  ;;  %3715 = vmatpush3.msra.mxu1 %v3399_v33 }
 0x302   : > { %3716 = vmatprep.subr.mxu1 %v3414_v34  ;;  %3771 = vset.pattern.permute.xlu0 %v3790_v36 }
 0x303   : > { %3717 = vmatpush3.msra.mxu1 %v3398_v35  ;;  %2225 = vperm.xlu0 %3771, %v3778_v37  }
 0x304   : > { %2663 = vmatmul.mubr.f32.vlgmr.msra.gmra.mxu1 %v4372_v29  ;;  %3772 = vset.pattern.permute.xlu1 %v3791_v38 }
 0x305   : > { %2447 = vperm.xlu1 %3772, %v3778_v37   ;;  %2891 = vmatprep.mubr.f32.mxu1 %v3788_v0 }
 0x306   : > { %2965 = vmatprep.mubr.f32.mxu0 %v3788_v0  ;;  %2849 = vmatprep.subr.mxu1 %v2822_v48 }
 0x307   : > { %3774 = vset.pattern.permute.xlu0 %v3789_v2  ;;  %2850 = vmatpush1.msra.mxu1 %v2821_v49 }
 0x308   : > { %2790 = vperm.xlu0 %3774, %v2787_v39   ;;  %2923 = vmatprep.subr.mxu0 %v2812_v52 }
 0x309   : > { %3773 = vset.pattern.permute.xlu1 %v3792_v40  ;;  %2924 = vmatpush1.msra.mxu0 %v2811_v54 }
 0x30a   : > { %2669 = vperm.xlu1 %3773, %v3778_v37   ;;  %2925 = vmatprep.subr.mxu0 %v2810_v56 }
 0x30b   : > { %2926 = vmatpush1.msra.mxu0 %v2809_v58 }
 0x30c   : > { %2927 = vmatprep.subr.mxu0 %v2808_v60 }
 0x30d   : > { %2928 = vmatpush1.msra.mxu0 %v2807_v62 }
 0x30e   : > { %3775 = vset.pattern.permute.xlu1 %v3789_v2  ;;  %v2820_v2 = vld [vmem:[%s5542_s23 + $0x38] sm:$0xff]  ;;  %2929 = vmatprep.subr.mxu0 %v2806_v63 }
 0x30f   : > { %2798 = vperm.xlu1 %3775, %v2795_v41   ;;  %2851 = vmatprep.subr.mxu1 %v2820_v2 }
 0x310   : > { %2852 = vmatpush1.msra.mxu1 %v2819_v50  ;;  %2930 = vmatpush1.msra.mxu0 %v2805_v1 }
 0x311   : > { %2853 = vmatprep.subr.mxu1 %v2818_v51  ;;  %2931 = vmatprep.subr.mxu0 %v2804_v3 }
 0x312   : > { %2854 = vmatpush1.msra.mxu1 %v2817_v53  ;;  %2932 = vmatpush1.msra.mxu0 %v2803_v4 }
 0x313   : > { %2855 = vmatprep.subr.mxu1 %v2816_v55  ;;  %3467 = vmatprep.subr.msk.mxu0 %vm835_vm0, %v3958_v7 }
 0x314   : > { %2856 = vmatpush1.msra.mxu1 %v2815_v57 }
 0x315   : > { %2857 = vmatprep.subr.mxu1 %v2814_v59 }
 0x316   : > { %2858 = vmatpush1.msra.mxu1 %v2813_v61 }
 0x33a   : > { %v1894_v42 = vpop.f32.mrf.mxu0 }
 0x33c   : > { %v1896_v45 = vpop.f32.mrf.mxu0 }
 0x33e   : > { %v1820_v43 = vpop.f32.mrf.mxu1 }
 0x33f   : > { %v5427_v44 = vadd.f32 %v1894_v42, %v1820_v43 }
 0x340   : > { %v1822_v46 = vpop.f32.mrf.mxu1 }
 0x341   : > { %v5429_v47 = vadd.f32 %v1896_v45, %v1822_v46 }
 0x343   : > { %v2975_v13 = vadd.f32 %v5429_v47, %v4370_v28 }
 0x35b   : > { %v3543_v5 = vpop.f32.mrf.mxu0 }
 0x35d   : > { %v3544_v8 = vpop.f32.mrf.mxu0 }
 0x35e   : > { %v3545_v22 = vadd.f32 %v3544_v8, %v3543_v5  ;;  %v3779_v5 = vld [vmem:[%s3955_s7] sm:$0xff] }
 0x35f   : > { %v3508_v6 = vpop.f32.mrf.mxu1 }
 0x360   : > { %v2118_v32 = vrot.slane %v3545_v22, %v2009_v21 }
 0x361   : > { %v3509_v10 = vpop.f32.mrf.mxu1 }
 0x362   : > { %v3510_v26 = vadd.f32 %v3509_v10, %v3508_v6  ;;  %v2119_v41 = vmul.f32 %v2118_v32, %v2005_v20  ;;  %v2972_v6 = vld [vmem:[%s5569_s6] sm:$0xff] }
 0x364   : > { %v2010_v37 = vrot.slane %v3510_v26, %v2009_v21 }
 0x366   : > { %v2011_v50 = vmul.f32 %v2010_v37, %v2005_v20 }
 0x37d   : > { %v3613_v9 = vpop.f32.mrf.mxu0 }
 0x37e   : > { %v2226_v27 = vpop.permute.xlu0 %2225 }
 0x37f   : > { %v3614_v12 = vpop.f32.mrf.mxu0 }
 0x380   : > { %v3615_v19 = vadd.f32 %v3614_v12, %v3613_v9  ;;  %v2448_v30 = vpop.permute.xlu1 %2447 }
 0x381   : > { %v3578_v11 = vpop.f32.mrf.mxu1 }
 0x382   : > { %v2340_v25 = vrot.slane %v3615_v19, %v2009_v21 }
 0x383   : > { %v3579_v15 = vpop.f32.mrf.mxu1  ;;  %v2791_v62 = vpop.permute.xlu0 %2790 }
 0x384   : > { %v3580_v7 = vadd.f32 %v3579_v15, %v3578_v11  ;;  %v2341_v36 = vmul.f32 %v2340_v25, %v2226_v27  ;;  %v2974_v15 = vadd.f32 %v5427_v44, %v4372_v29 }
 0x385   : > { %v2670_v40 = vpop.permute.xlu1 %2669 }
 0x386   : > { %v2231_v34 = vrot.slane %v3580_v7, %v2009_v21  ;;  %v2342_v48 = vadd.f32 %v2341_v36, %v2119_v41 }
 0x388   : > { %v2232_v46 = vmul.f32 %v2231_v34, %v2226_v27 }
 0x38a   : > { %v2799_v56 = vpop.permute.xlu1 %2798  ;;  %v2233_v57 = vadd.f32 %v2232_v46, %v2011_v50 }
 0x39f   : > { %v3683_v14 = vpop.f32.mrf.mxu0 }
 0x3a1   : > { %v3684_v18 = vpop.f32.mrf.mxu0 }
 0x3a2   : > { %v3685_v23 = vadd.f32 %v3684_v18, %v3683_v14 }
 0x3a3   : > { %v3648_v17 = vpop.f32.mrf.mxu1 }
 0x3a4   : > { %v2562_v33 = vrot.slane %v3685_v23, %v2009_v21 }
 0x3a5   : > { %v3649_v24 = vpop.f32.mrf.mxu1 }
 0x3a6   : > { %v3650_v31 = vadd.f32 %v3649_v24, %v3648_v17  ;;  %v2563_v42 = vmul.f32 %v2562_v33, %v2448_v30  ;;  %v2973_v17 = vld [vmem:[%s5570_s30] sm:$0xff] }
 0x3a8   : > { %v2453_v38 = vrot.slane %v3650_v31, %v2009_v21  ;;  %v2564_v53 = vadd.f32 %v2563_v42, %v2342_v48 }
 0x3aa   : > { %v2454_v51 = vmul.f32 %v2453_v38, %v2448_v30 }
 0x3ac   : > { %v2455_v59 = vadd.f32 %v2454_v51, %v2233_v57 }
 0x3c1   : > { %v3753_v35 = vpop.f32.mrf.mxu0 }
 0x3c3   : > { %v3754_v39 = vpop.f32.mrf.mxu0 }
 0x3c4   : > { %v3755_v43 = vadd.f32 %v3754_v39, %v3753_v35  ;;  %v3718_v45 = vpop.f32.mrf.mxu1 }
 0x3c6   : > { %v2784_v49 = vrot.slane %v3755_v43, %v2009_v21  ;;  %v3719_v2 = vpop.f32.mrf.mxu1 }
 0x3c7   : > { %v3720_v52 = vadd.f32 %v3719_v2, %v3718_v45 }
 0x3c8   : > { %v2785_v54 = vmul.f32 %v2784_v49, %v2670_v40 }
 0x3c9   : > { %v2675_v55 = vrot.slane %v3720_v52, %v2009_v21 }
 0x3ca   : > { %v2786_v58 = vadd.f32 %v2785_v54, %v2564_v53 }
 0x3cb   : > { %v2676_v60 = vmul.f32 %v2675_v55, %v2670_v40 }
 0x3cc   : > { %v2801_v61 = vadd.f32 %v2799_v56, %v2786_v58 }
 0x3cd   : > { %v2677_v63 = vadd.f32 %v2676_v60, %v2455_v59 }
 0x3ce   : > { %v2802_v1 = vmax.f32 %v2801_v61, 0.0 }
 0x3cf   : > { %v2793_v3 = vadd.f32 %v2791_v62, %v2677_v63 }
 0x3d0   : > { %3462 = vmatmul.mubr.msk.f32.vlgmr.msra.gmra.mxu1 %vm2823_vm3, %v2802_v1 }
 0x3d1   : > { %v2794_v4 = vmax.f32 %v2793_v3, 0.0  ;;  %3051 = vmatprep.mubr.f32.mxu1 %v3788_v0 }
 0x3d3   : > { %3463 = vmatmul.mubr.msk.f32.vlgmr.msra.gmra.mxu0 %vm2823_vm3, %v2794_v4 }
 0x3d4   : > { %3468 = vmatpush1.msk.msra.mxu0 %vm835_vm0, %v3779_v5  ;;  %3125 = vmatprep.mubr.f32.mxu0 %v3788_v0 }
 0x3d7   : > { %3469 = vmatmul.mubr.msk.f32.vlgmr.msra.gmra.mxu0 %vm831_vm1, %v2972_v6 }
 0x490   : > { %v2893_v8 = vpop.f32.mrf.mxu1 }
 0x492   : > { %v2895_v10 = vpop.f32.mrf.mxu1 }
 0x493   : > { %v2967_v9 = vpop.f32.mrf.mxu0 }
 0x494   : > { %v2968_v11 = vadd.f32 %v2967_v9, %v2893_v8 }
 0x495   : > { %v2969_v12 = vpop.f32.mrf.mxu0 }
 0x496   : > { %v2970_v14 = vadd.f32 %v2969_v12, %v2895_v10  ;;  %v2976_v16 = vadd.f32 %v2974_v15, %v2968_v11 }
 0x497   : > { %v3127_v18 = vpop.f32.mrf.mxu0 }
 0x498   : > { %v2977_v0 = vadd.f32 %v2975_v13, %v2970_v14 }
 0x499   : > { %v3129_v44 = vpop.f32.mrf.mxu0 }
 0x49a   : > { %3464 = vmatprep.subr.msk.mxu1 %vm835_vm0, %v2977_v0 }
 0x49b   : > { %3465 = vmatpush1.msk.msra.mxu1 %vm835_vm0, %v2976_v16 }
 0x49c   : > { %3466 = vmatmul.mubr.msk.f32.vlgmr.msra.gmra.mxu1 %vm831_vm1, %v2973_v17 }
 0x55c   : > { %v3053_v19 = vpop.f32.mrf.mxu1 }
 0x55d   : > { %v3128_v28 = vadd.f32 %v3127_v18, %v3053_v19 }
 0x55e   : > { %v3055_v29 = vpop.f32.mrf.mxu1 }
 0x55f   : > { %3132 = vst [vmem:[%s824_s9] sm:$0xff] %v3128_v28  ;;  %v3130_v47 = vadd.f32 %v3129_v44, %v3055_v29 }
 0x561   : > { %3133 = vst [vmem:[%s824_s9 + $0x8] sm:$0xff] %v3130_v47 }
 0x562 PF: > { %s37_s27 = sadd.s32 1, %s3786_s27  }
 0x563   : > { %p34_p4 = scmp.ge.s32.totalorder %s37_s27, 4  }
 0x565   :  { %36 = sbr.rel (!%p34_p4) target bundleno = 12 (0xc), region = 171 }

</bundles_post_ra>
